<compile_context>
chip_gen: v6e
topology: v6e:2x2x1
jax: 0.10.0
libtpu: 0.0.40
codegen_flags: <defaults>
</compile_context>

<pallas_src>
import functools

import jax
import jax.numpy as jnp
import numpy as np
from jax import lax
from jax.experimental import pallas as pl
from jax.experimental.pallas import tpu as pltpu


def _round_up(x, m):
    return (x + m - 1) // m * m


# ----------------------------------------------------------------------------
# Pallas kernel: one (direction, time-chunk) grid step of the packed LSTM.
#   len_ref : (B_pad, 1) int32 sequence lengths (padded rows have length 0)
#   xg_ref  : (Tc, B_pad, 4*Hp)  precomputed x@W_ih^T + bias for this direction
#   whh_ref : (Hp, 4*Hp)         recurrent weights for this direction
#   out_ref : (Tc, B_pad, Hp)    hidden-state outputs for this direction/chunk
#   h_ref/c_ref : (B_pad, Hp)    VMEM state scratch carried across chunks
# Gate column layout is [i | f | o | g] (reordered wrapper-side).
# ----------------------------------------------------------------------------
def _lstm_dir_kernel(len_ref, xg_ref, whh_ref, out_ref, h_ref, c_ref, *,
                     chunk_len, hidden_p, num_chunks):
    Tc, Hp, nc = chunk_len, hidden_p, num_chunks
    d = pl.program_id(0)     # direction: 0 = forward, 1 = backward
    j = pl.program_id(1)     # chunk step within this direction

    @pl.when(j == 0)
    def _():
        h_ref[...] = jnp.zeros_like(h_ref)
        c_ref[...] = jnp.zeros_like(c_ref)

    # Loop-invariant loads, hoisted out of the time loop.
    lens = len_ref[...]          # (B_pad, 1) int32
    whh = whh_ref[...]           # (Hp, 4*Hp), matmul dtype

    # Time chunk owned by this grid step (backward walks chunks in reverse).
    chunk = j + d * (nc - 1 - 2 * j)
    t0 = chunk * Tc

    def step(s, carry):
        # Local time index within the chunk (forward: s, backward: Tc-1-s).
        tl = s + d * (Tc - 1 - 2 * s)
        tg = t0 + tl             # global time index, for the length mask

        # Recurrent dot only; input projection + bias already folded into xg.
        gates = (xg_ref[tl].astype(jnp.float32) +
                 jnp.dot(h_ref[...].astype(whh.dtype), whh,
                         preferred_element_type=jnp.float32))

        # Gate layout [i | f | o | g]: one sigmoid push + one tanh push.
        sig = jax.nn.sigmoid(gates[:, 0:3 * Hp])
        i = sig[:, 0:Hp]
        f = sig[:, Hp:2 * Hp]
        o = sig[:, 2 * Hp:3 * Hp]
        g = jnp.tanh(gates[:, 3 * Hp:4 * Hp])

        c_new = f * c_ref[...] + i * g
        h_new = o * jnp.tanh(c_new)

        # Packed-sequence semantics: freeze state / zero output past length.
        mask = lens > tg
        h_ref[...] = jnp.where(mask, h_new, h_ref[...])
        c_ref[...] = jnp.where(mask, c_new, c_ref[...])
        out_ref[tl] = jnp.where(mask, h_new, 0.0).astype(out_ref.dtype)
        return carry

    lax.fori_loop(0, Tc, step, 0, unroll=min(Tc, 4))


# ----------------------------------------------------------------------------
# Weight prep: transpose, reorder PyTorch gate blocks [i,f,g,o] -> [i,f,o,g],
# zero-pad the hidden dim H -> Hp (padded gate columns stay exactly zero
# through the recurrence: sigmoid(0)*tanh(0) contributions vanish).
# ----------------------------------------------------------------------------
def _prep_direction(w_ih, w_hh, b_ih, b_hh, H, Hp):
    order = (0, 1, 3, 2)                      # i, f, o, g
    bias = (b_ih + b_hh).astype(jnp.float32)
    w_in_cols, w_hh_cols, b_cols = [], [], []
    for gsrc in order:
        wi = w_ih[gsrc * H:(gsrc + 1) * H, :].T.astype(jnp.float32)   # (D, H)
        wh = w_hh[gsrc * H:(gsrc + 1) * H, :].T.astype(jnp.float32)   # (H, H)
        bb = bias[gsrc * H:(gsrc + 1) * H]
        w_in_cols.append(jnp.pad(wi, ((0, 0), (0, Hp - H))))
        w_hh_cols.append(jnp.pad(wh, ((0, Hp - H), (0, Hp - H))))
        b_cols.append(jnp.pad(bb, (0, Hp - H)))
    return (jnp.concatenate(w_in_cols, axis=1),    # (D, 4*Hp)
            jnp.concatenate(w_hh_cols, axis=1),    # (Hp, 4*Hp)
            jnp.concatenate(b_cols, axis=0))       # (4*Hp,)


# ----------------------------------------------------------------------------
# Wrapper reproducing Seq2SeqEncoder.forward (LSTM, num_layers=1, bias=True,
# dropout=0.0).
# ----------------------------------------------------------------------------
def seq2seq_encoder_forward(sequences_batch, sequences_lengths, params,
                            bidirectional=True, time_chunk=None,
                            matmul_dtype=jnp.float32):
    B, T, D = sequences_batch.shape
    H = params["w_hh_f"].shape[1]
    num_dirs = 2 if bidirectional else 1
    dirs = ["f", "b"][:num_dirs]

    # Padded layout: B -> multiple of 8 (sublanes), H -> multiple of 128 (lanes)
    # so elementwise/EUP work runs on full vregs and stores are lane-dense.
    B_pad = _round_up(B, 8)
    Hp = _round_up(H, 128)

    # Time-chunk size: bound the double-buffered chunk working set so it fits
    # v7x's 64 MiB VMEM (as well as v5e/v6e 128 MiB) with headroom.
    in_bytes = np.dtype(matmul_dtype).itemsize
    if time_chunk is None:
        per_t = B_pad * (4 * Hp * in_bytes + Hp * 4)   # xg row + f32 out row
        time_chunk = max(1, int((20 * 1024 * 1024) // (2 * per_t)))
    Tc = int(min(time_chunk, T))
    nc = -(-T // Tc)
    T_pad = nc * Tc

    # Per-direction fused/reordered/padded weights.
    w_in_list, whh_list, b_list = [], [], []
    for dname in dirs:
        wi, wh, bb = _prep_direction(params[f"w_ih_{dname}"], params[f"w_hh_{dname}"],
                                     params[f"b_ih_{dname}"], params[f"b_hh_{dname}"],
                                     H, Hp)
        w_in_list.append(wi)
        whh_list.append(wh)
        b_list.append(bb)
    w_in = jnp.concatenate(w_in_list, axis=1)                 # (D, nd*4Hp)
    b_in = jnp.concatenate(b_list, axis=0)                    # (nd*4Hp,)
    whh = jnp.stack(whh_list, axis=0).astype(matmul_dtype)    # (nd, Hp, 4Hp)

    # Hoisted input projection: transpose the SMALL x to time-major first, then
    # one wide MXU-friendly matmul directly produces xg in time-major layout.
    x_tm = jnp.transpose(sequences_batch.astype(jnp.float32), (1, 0, 2))  # (T,B,D)
    x_tm = jnp.pad(x_tm, ((0, T_pad - T), (0, B_pad - B), (0, 0)))
    xg = (jnp.einsum("tbd,dg->tbg", x_tm, w_in,
                     preferred_element_type=jnp.float32)
          + b_in).astype(matmul_dtype)                        # (T_pad,B_pad,nd*4Hp)
    # TODO(synk): for production T, compute this projection inside the chunked
    #             kernel from x-chunks to remove the xg HBM round trip.

    lengths = jnp.asarray(sequences_lengths, jnp.int32).reshape(B, 1)
    lengths = jnp.pad(lengths, ((0, B_pad - B), (0, 0)))      # pad rows: len 0

    kernel = functools.partial(_lstm_dir_kernel, chunk_len=Tc, hidden_p=Hp,
                               num_chunks=nc)

    def chunk_idx(d, j):
        # forward (d=0): j ; backward (d=1): nc-1-j
        return j + d * (nc - 1 - 2 * j)

    grid_spec = pltpu.PrefetchScalarGridSpec(
        num_scalar_prefetch=0,
        grid=(num_dirs, nc),
        in_specs=[
            pl.BlockSpec((B_pad, 1), lambda d, j: (0, 0)),                    # lens
            pl.BlockSpec((Tc, B_pad, 4 * Hp),
                         lambda d, j: (chunk_idx(d, j), 0, d)),               # xg
            pl.BlockSpec((None, Hp, 4 * Hp), lambda d, j: (d, 0, 0)),         # W_hh^T
        ],
        out_specs=pl.BlockSpec((Tc, B_pad, Hp),
                               lambda d, j: (chunk_idx(d, j), 0, d)),
        scratch_shapes=[
            pltpu.VMEM((B_pad, Hp), jnp.float32),   # h state (persists over chunks)
            pltpu.VMEM((B_pad, Hp), jnp.float32),   # c state
        ],
    )

    out_tm = pl.pallas_call(
        kernel,
        out_shape=jax.ShapeDtypeStruct((T_pad, B_pad, num_dirs * Hp), jnp.float32),
        grid_spec=grid_spec,
        compiler_params=pltpu.CompilerParams(
            # direction axis parallel (2 TCs on v7x), chunk axis sequential
            dimension_semantics=("parallel", "arbitrary"),
            vmem_limit_bytes=48 * 1024 * 1024,      # fits v7x 64 MiB w/ headroom
        ),
    )(lengths, xg, whh)

    # Strip padding; forward hidden in lanes [0:H], backward in [Hp:Hp+H].
    out_f = out_tm[:T, :B, 0:H]
    if bidirectional:
        out_b = out_tm[:T, :B, Hp:Hp + H]
        out = jnp.concatenate([out_f, out_b], axis=-1)
    else:
        out = out_f
    return jnp.transpose(out, (1, 0, 2))            # (B, T, num_dirs*H)


# ----------------------------------------------------------------------------
# Pure-JAX reference (mirrors torch packed-sequence semantics, PyTorch weight
# layout, f32 throughout) for validation.
# ----------------------------------------------------------------------------
def _lstm_reference(x_btd, lengths, w_ih, w_hh, b_ih, b_hh, reverse):
    B, T, D = x_btd.shape
    H = w_hh.shape[1]
    h = jnp.zeros((B, H), jnp.float32)
    c = jnp.zeros((B, H), jnp.float32)
    out = jnp.zeros((T, B, H), jnp.float32)
    order = range(T - 1, -1, -1) if reverse else range(T)
    for t in order:
        x = x_btd[:, t, :]
        gates = x @ w_ih.T + h @ w_hh.T + b_ih + b_hh
        i = jax.nn.sigmoid(gates[:, :H])
        f = jax.nn.sigmoid(gates[:, H:2 * H])
        g = jnp.tanh(gates[:, 2 * H:3 * H])
        o = jax.nn.sigmoid(gates[:, 3 * H:])
        c_new = f * c + i * g
        h_new = o * jnp.tanh(c_new)
        mask = (lengths > t)[:, None]
        c = jnp.where(mask, c_new, c)
        h = jnp.where(mask, h_new, h)
        out = out.at[t].set(jnp.where(mask, h_new, 0.0))
    return jnp.transpose(out, (1, 0, 2))


def reference_forward(x, lengths, params, bidirectional=True):
    out_f = _lstm_reference(x, lengths, params["w_ih_f"], params["w_hh_f"],
                            params["b_ih_f"], params["b_hh_f"], reverse=False)
    if not bidirectional:
        return out_f
    out_b = _lstm_reference(x, lengths, params["w_ih_b"], params["w_hh_b"],
                            params["b_ih_b"], params["b_hh_b"], reverse=True)
    return jnp.concatenate([out_f, out_b], axis=-1)


if __name__ == "__main__":
    # Small shapes consistent with the module: batch=4, seq=8, input=16, hidden=32.
    B, T, D, H = 4, 8, 16, 32
    bidirectional = True

    key = jax.random.PRNGKey(0)
    keys = jax.random.split(key, 16)
    bound = 1.0 / np.sqrt(H)

    def uinit(k, shape):
        return jax.random.uniform(k, shape, jnp.float32, -bound, bound)

    params = {
        "w_ih_f": uinit(keys[0], (4 * H, D)),
        "w_hh_f": uinit(keys[1], (4 * H, H)),
        "b_ih_f": uinit(keys[2], (4 * H,)),
        "b_hh_f": uinit(keys[3], (4 * H,)),
        "w_ih_b": uinit(keys[4], (4 * H, D)),
        "w_hh_b": uinit(keys[5], (4 * H, H)),
        "b_ih_b": uinit(keys[6], (4 * H,)),
        "b_hh_b": uinit(keys[7], (4 * H,)),
    }

    sequences_batch = jax.random.normal(keys[8], (B, T, D), jnp.float32)
    lengths_host = np.array([8, 5, 3, 6], dtype=np.int32)   # variable lengths
    sequences_lengths = jnp.asarray(lengths_host)

    # pad_packed_sequence pads only up to max(lengths): truncate like PyTorch.
    t_out = int(lengths_host.max())
    ref = reference_forward(sequences_batch, sequences_lengths, params,
                            bidirectional=bidirectional)[:, :t_out, :]
    ref = np.asarray(jax.block_until_ready(ref))

    # 1) f32 matmul path, chunked time grid (nc=2) — tight tolerance.
    out_f32 = seq2seq_encoder_forward(sequences_batch, sequences_lengths, params,
                                      bidirectional=bidirectional,
                                      time_chunk=4, matmul_dtype=jnp.float32)
    out_f32 = np.asarray(jax.block_until_ready(out_f32))[:, :t_out, :]
    np.testing.assert_allclose(out_f32, ref, atol=1e-4, rtol=1e-4)

    # 2) bf16 matmul operands (f32 accumulation / state), auto chunk size.
    out_bf16 = seq2seq_encoder_forward(sequences_batch, sequences_lengths, params,
                                       bidirectional=bidirectional,
                                       time_chunk=None, matmul_dtype=jnp.bfloat16)
    out_bf16 = np.asarray(jax.block_until_ready(out_bf16))[:, :t_out, :]
    np.testing.assert_allclose(out_bf16, ref, atol=5e-2, rtol=5e-2)

    print("KERNEL_OK")
</pallas_src>

<mosaic_0001>
module attributes {stable_mosaic.version = 11 : i64} {
  func.func @_lstm_dir_kernel(%arg0: i32, %arg1: i32, %arg2: memref<8x1xi32, #tpu.memory_space<vmem>>, %arg3: memref<4x8x512xf32, #tpu.memory_space<vmem>>, %arg4: memref<1x128x512xf32, #tpu.memory_space<vmem>>, %arg5: memref<4x8x128xf32, #tpu.memory_space<vmem>>, %arg6: memref<8x128xf32, #tpu.memory_space<vmem>>, %arg7: memref<8x128xf32, #tpu.memory_space<vmem>>) attributes {dimension_semantics = [#tpu.dimension_semantics<parallel>, #tpu.dimension_semantics<arbitrary>], iteration_bounds = array<i64: 2, 2>, scalar_prefetch = 0 : i64, scratch_operands = 2 : i64, tpu.core_type = #tpu.core_type<tc>, window_params = [{pipeline_mode = #tpu.pipeline_mode<synchronous>, transform_indices = @transform_0, window_bounds = array<i64: 8, 1>}, {transform_indices = @transform_1, window_bounds = array<i64: 4, 8, 512>}, {transform_indices = @transform_2, window_bounds = array<i64: 1, 128, 512>}, {transform_indices = @transform_3, window_bounds = array<i64: 4, 8, 128>}]} {
    %c0_i32 = arith.constant 0 : i32
    %0 = arith.cmpi eq, %arg1, %c0_i32 : i32
    %1 = arith.extui %0 : i1 to i32
    %c0_i32_0 = arith.constant 0 : i32
    %2 = arith.cmpi ne, %1, %c0_i32_0 : i32
    scf.if %2 {
      %cst_92 = arith.constant 0.000000e+00 : f32
      %203 = vector.broadcast %cst_92 : f32 to vector<8x128xf32>
      %c0_93 = arith.constant 0 : index
      %c0_94 = arith.constant 0 : index
      %204 = vector.load %arg6[%c0_93, %c0_94] : memref<8x128xf32, #tpu.memory_space<vmem>>, vector<8x128xf32>
      tpu.vector_store %arg6[%c0_93, %c0_94], %203 {strides = array<i32>} : memref<8x128xf32, #tpu.memory_space<vmem>>, vector<8x128xf32>,
      %cst_95 = arith.constant 0.000000e+00 : f32
      %205 = vector.broadcast %cst_95 : f32 to vector<8x128xf32>
      %c0_96 = arith.constant 0 : index
      %c0_97 = arith.constant 0 : index
      %206 = vector.load %arg7[%c0_96, %c0_97] : memref<8x128xf32, #tpu.memory_space<vmem>>, vector<8x128xf32>
      tpu.vector_store %arg7[%c0_96, %c0_97], %205 {strides = array<i32>} : memref<8x128xf32, #tpu.memory_space<vmem>>, vector<8x128xf32>,
    } else {
    }
    %c0 = arith.constant 0 : index
    %c0_1 = arith.constant 0 : index
    %3 = vector.load %arg2[%c0, %c0_1] : memref<8x1xi32, #tpu.memory_space<vmem>>, vector<8x1xi32>
    %c0_2 = arith.constant 0 : index
    %c0_3 = arith.constant 0 : index
    %c0_4 = arith.constant 0 : index
    %4 = vector.load %arg4[%c0_2, %c0_3, %c0_4] : memref<1x128x512xf32, #tpu.memory_space<vmem>>, vector<1x128x512xf32>
    %5 = vector.shape_cast %4 : vector<1x128x512xf32> to vector<128x512xf32>
    %c2_i32 = arith.constant 2 : i32
    %6 = arith.muli %c2_i32, %arg1 : i32
    %c1_i32 = arith.constant 1 : i32
    %7 = arith.subi %c1_i32, %6 : i32
    %8 = arith.muli %arg0, %7 : i32
    %9 = arith.addi %arg1, %8 : i32
    %c4_i32 = arith.constant 4 : i32
    %10 = arith.muli %9, %c4_i32 : i32
    %c0_i32_5 = arith.constant 0 : i32
    %c2_i32_6 = arith.constant 2 : i32
    %11 = arith.muli %c2_i32_6, %c0_i32_5 : i32
    %c3_i32 = arith.constant 3 : i32
    %12 = arith.subi %c3_i32, %11 : i32
    %13 = arith.muli %arg0, %12 : i32
    %14 = arith.addi %c0_i32_5, %13 : i32
    %15 = arith.addi %10, %14 : i32
    %16 = arith.index_cast %14 : i32 to index
    %c0_7 = arith.constant 0 : index
    %c0_8 = arith.constant 0 : index
    %17 = vector.load %arg3[%16, %c0_7, %c0_8] : memref<4x8x512xf32, #tpu.memory_space<vmem>>, vector<1x8x512xf32>
    %18 = vector.shape_cast %17 : vector<1x8x512xf32> to vector<8x512xf32>
    %c0_9 = arith.constant 0 : index
    %c0_10 = arith.constant 0 : index
    %19 = vector.load %arg6[%c0_9, %c0_10] : memref<8x128xf32, #tpu.memory_space<vmem>>, vector<8x128xf32>
    %cst = arith.constant dense<0.000000e+00> : vector<8x512xf32>
    %20 = tpu.matmul %19, %5, %cst {dimension_numbers = #tpu.dot_dimension_numbers<[1], [0], [0], [1], [0, 0, 1, 1], [], []>} : vector<8x128xf32>, vector<128x512xf32>, vector<8x512xf32> -> vector<8x512xf32>
    %21 = arith.addf %18, %20 : vector<8x512xf32>
    %22 = vector.extract_strided_slice %21 {offsets = [0, 0], sizes = [8, 384], strides = [1, 1]} : vector<8x512xf32> to vector<8x384xf32>
    %23 = arith.negf %22 : vector<8x384xf32>
    %24 = math.exp %23 : vector<8x384xf32>
    %cst_11 = arith.constant 1.000000e+00 : f32
    %25 = vector.broadcast %cst_11 : f32 to vector<8x384xf32>
    %26 = arith.addf %25, %24 : vector<8x384xf32>
    %27 = arith.divf %25, %26 : vector<8x384xf32>
    %28 = vector.extract_strided_slice %27 {offsets = [0, 0], sizes = [8, 128], strides = [1, 1]} : vector<8x384xf32> to vector<8x128xf32>
    %29 = vector.extract_strided_slice %27 {offsets = [0, 128], sizes = [8, 128], strides = [1, 1]} : vector<8x384xf32> to vector<8x128xf32>
    %30 = vector.extract_strided_slice %27 {offsets = [0, 256], sizes = [8, 128], strides = [1, 1]} : vector<8x384xf32> to vector<8x128xf32>
    %31 = vector.extract_strided_slice %21 {offsets = [0, 384], sizes = [8, 128], strides = [1, 1]} : vector<8x512xf32> to vector<8x128xf32>
    %32 = math.tanh %31 : vector<8x128xf32>
    %c0_12 = arith.constant 0 : index
    %c0_13 = arith.constant 0 : index
    %33 = vector.load %arg7[%c0_12, %c0_13] : memref<8x128xf32, #tpu.memory_space<vmem>>, vector<8x128xf32>
    %34 = arith.mulf %29, %33 : vector<8x128xf32>
    %35 = arith.mulf %28, %32 : vector<8x128xf32>
    %36 = arith.addf %34, %35 : vector<8x128xf32>
    %37 = math.tanh %36 : vector<8x128xf32>
    %38 = arith.mulf %30, %37 : vector<8x128xf32>
    %39 = vector.broadcast %15 : i32 to vector<8x1xi32>
    %40 = arith.cmpi sgt, %3, %39 : vector<8x1xi32>
    %c0_14 = arith.constant 0 : index
    %c0_15 = arith.constant 0 : index
    %41 = vector.load %arg6[%c0_14, %c0_15] : memref<8x128xf32, #tpu.memory_space<vmem>>, vector<8x128xf32>
    %42 = vector.shape_cast %40 : vector<8x1xi1> to vector<8x1xi1>
    %43 = vector.broadcast %42 : vector<8x1xi1> to vector<8x128xi1>
    %44 = arith.select %43, %38, %41 : vector<8x128xi1>, vector<8x128xf32>
    %c0_16 = arith.constant 0 : index
    %c0_17 = arith.constant 0 : index
    %45 = vector.load %arg6[%c0_16, %c0_17] : memref<8x128xf32, #tpu.memory_space<vmem>>, vector<8x128xf32>
    tpu.vector_store %arg6[%c0_16, %c0_17], %44 {strides = array<i32>} : memref<8x128xf32, #tpu.memory_space<vmem>>, vector<8x128xf32>,
    %c0_18 = arith.constant 0 : index
    %c0_19 = arith.constant 0 : index
    %46 = vector.load %arg7[%c0_18, %c0_19] : memref<8x128xf32, #tpu.memory_space<vmem>>, vector<8x128xf32>
    %47 = vector.shape_cast %40 : vector<8x1xi1> to vector<8x1xi1>
    %48 = vector.broadcast %47 : vector<8x1xi1> to vector<8x128xi1>
    %49 = arith.select %48, %36, %46 : vector<8x128xi1>, vector<8x128xf32>
    %c0_20 = arith.constant 0 : index
    %c0_21 = arith.constant 0 : index
    %50 = vector.load %arg7[%c0_20, %c0_21] : memref<8x128xf32, #tpu.memory_space<vmem>>, vector<8x128xf32>
    tpu.vector_store %arg7[%c0_20, %c0_21], %49 {strides = array<i32>} : memref<8x128xf32, #tpu.memory_space<vmem>>, vector<8x128xf32>,
    %cst_22 = arith.constant 0.000000e+00 : f32
    %51 = vector.shape_cast %40 : vector<8x1xi1> to vector<8x1xi1>
    %52 = vector.broadcast %51 : vector<8x1xi1> to vector<8x128xi1>
    %53 = vector.broadcast %cst_22 : f32 to vector<8x128xf32>
    %54 = arith.select %52, %38, %53 : vector<8x128xi1>, vector<8x128xf32>
    %55 = arith.index_cast %14 : i32 to index
    %c0_23 = arith.constant 0 : index
    %c0_24 = arith.constant 0 : index
    %56 = vector.load %arg5[%55, %c0_23, %c0_24] : memref<4x8x128xf32, #tpu.memory_space<vmem>>, vector<1x8x128xf32>
    %57 = vector.shape_cast %56 : vector<1x8x128xf32> to vector<8x128xf32>
    %58 = vector.shape_cast %54 : vector<8x128xf32> to vector<1x8x128xf32>
    tpu.vector_store %arg5[%55, %c0_23, %c0_24], %58 {strides = array<i32>} : memref<4x8x128xf32, #tpu.memory_space<vmem>>, vector<1x8x128xf32>,
    %c1_i32_25 = arith.constant 1 : i32
    %c2_i32_26 = arith.constant 2 : i32
    %59 = arith.muli %c2_i32_26, %c1_i32_25 : i32
    %c3_i32_27 = arith.constant 3 : i32
    %60 = arith.subi %c3_i32_27, %59 : i32
    %61 = arith.muli %arg0, %60 : i32
    %62 = arith.addi %c1_i32_25, %61 : i32
    %63 = arith.addi %10, %62 : i32
    %64 = arith.index_cast %62 : i32 to index
    %c0_28 = arith.constant 0 : index
    %c0_29 = arith.constant 0 : index
    %65 = vector.load %arg3[%64, %c0_28, %c0_29] : memref<4x8x512xf32, #tpu.memory_space<vmem>>, vector<1x8x512xf32>
    %66 = vector.shape_cast %65 : vector<1x8x512xf32> to vector<8x512xf32>
    %c0_30 = arith.constant 0 : index
    %c0_31 = arith.constant 0 : index
    %67 = vector.load %arg6[%c0_30, %c0_31] : memref<8x128xf32, #tpu.memory_space<vmem>>, vector<8x128xf32>
    %cst_32 = arith.constant dense<0.000000e+00> : vector<8x512xf32>
    %68 = tpu.matmul %67, %5, %cst_32 {dimension_numbers = #tpu.dot_dimension_numbers<[1], [0], [0], [1], [0, 0, 1, 1], [], []>} : vector<8x128xf32>, vector<128x512xf32>, vector<8x512xf32> -> vector<8x512xf32>
    %69 = arith.addf %66, %68 : vector<8x512xf32>
    %70 = vector.extract_strided_slice %69 {offsets = [0, 0], sizes = [8, 384], strides = [1, 1]} : vector<8x512xf32> to vector<8x384xf32>
    %71 = arith.negf %70 : vector<8x384xf32>
    %72 = math.exp %71 : vector<8x384xf32>
    %cst_33 = arith.constant 1.000000e+00 : f32
    %73 = vector.broadcast %cst_33 : f32 to vector<8x384xf32>
    %74 = arith.addf %73, %72 : vector<8x384xf32>
    %75 = arith.divf %73, %74 : vector<8x384xf32>
    %76 = vector.extract_strided_slice %75 {offsets = [0, 0], sizes = [8, 128], strides = [1, 1]} : vector<8x384xf32> to vector<8x128xf32>
    %77 = vector.extract_strided_slice %75 {offsets = [0, 128], sizes = [8, 128], strides = [1, 1]} : vector<8x384xf32> to vector<8x128xf32>
    %78 = vector.extract_strided_slice %75 {offsets = [0, 256], sizes = [8, 128], strides = [1, 1]} : vector<8x384xf32> to vector<8x128xf32>
    %79 = vector.extract_strided_slice %69 {offsets = [0, 384], sizes = [8, 128], strides = [1, 1]} : vector<8x512xf32> to vector<8x128xf32>
    %80 = math.tanh %79 : vector<8x128xf32>
    %c0_34 = arith.constant 0 : index
    %c0_35 = arith.constant 0 : index
    %81 = vector.load %arg7[%c0_34, %c0_35] : memref<8x128xf32, #tpu.memory_space<vmem>>, vector<8x128xf32>
    %82 = arith.mulf %77, %81 : vector<8x128xf32>
    %83 = arith.mulf %76, %80 : vector<8x128xf32>
    %84 = arith.addf %82, %83 : vector<8x128xf32>
    %85 = math.tanh %84 : vector<8x128xf32>
    %86 = arith.mulf %78, %85 : vector<8x128xf32>
    %87 = vector.broadcast %63 : i32 to vector<8x1xi32>
    %88 = arith.cmpi sgt, %3, %87 : vector<8x1xi32>
    %c0_36 = arith.constant 0 : index
    %c0_37 = arith.constant 0 : index
    %89 = vector.load %arg6[%c0_36, %c0_37] : memref<8x128xf32, #tpu.memory_space<vmem>>, vector<8x128xf32>
    %90 = vector.shape_cast %88 : vector<8x1xi1> to vector<8x1xi1>
    %91 = vector.broadcast %90 : vector<8x1xi1> to vector<8x128xi1>
    %92 = arith.select %91, %86, %89 : vector<8x128xi1>, vector<8x128xf32>
    %c0_38 = arith.constant 0 : index
    %c0_39 = arith.constant 0 : index
    %93 = vector.load %arg6[%c0_38, %c0_39] : memref<8x128xf32, #tpu.memory_space<vmem>>, vector<8x128xf32>
    tpu.vector_store %arg6[%c0_38, %c0_39], %92 {strides = array<i32>} : memref<8x128xf32, #tpu.memory_space<vmem>>, vector<8x128xf32>,
    %c0_40 = arith.constant 0 : index
    %c0_41 = arith.constant 0 : index
    %94 = vector.load %arg7[%c0_40, %c0_41] : memref<8x128xf32, #tpu.memory_space<vmem>>, vector<8x128xf32>
    %95 = vector.shape_cast %88 : vector<8x1xi1> to vector<8x1xi1>
    %96 = vector.broadcast %95 : vector<8x1xi1> to vector<8x128xi1>
    %97 = arith.select %96, %84, %94 : vector<8x128xi1>, vector<8x128xf32>
    %c0_42 = arith.constant 0 : index
    %c0_43 = arith.constant 0 : index
    %98 = vector.load %arg7[%c0_42, %c0_43] : memref<8x128xf32, #tpu.memory_space<vmem>>, vector<8x128xf32>
    tpu.vector_store %arg7[%c0_42, %c0_43], %97 {strides = array<i32>} : memref<8x128xf32, #tpu.memory_space<vmem>>, vector<8x128xf32>,
    %cst_44 = arith.constant 0.000000e+00 : f32
    %99 = vector.shape_cast %88 : vector<8x1xi1> to vector<8x1xi1>
    %100 = vector.broadcast %99 : vector<8x1xi1> to vector<8x128xi1>
    %101 = vector.broadcast %cst_44 : f32 to vector<8x128xf32>
    %102 = arith.select %100, %86, %101 : vector<8x128xi1>, vector<8x128xf32>
    %103 = arith.index_cast %62 : i32 to index
    %c0_45 = arith.constant 0 : index
    %c0_46 = arith.constant 0 : index
    %104 = vector.load %arg5[%103, %c0_45, %c0_46] : memref<4x8x128xf32, #tpu.memory_space<vmem>>, vector<1x8x128xf32>
    %105 = vector.shape_cast %104 : vector<1x8x128xf32> to vector<8x128xf32>
    %106 = vector.shape_cast %102 : vector<8x128xf32> to vector<1x8x128xf32>
    tpu.vector_store %arg5[%103, %c0_45, %c0_46], %106 {strides = array<i32>} : memref<4x8x128xf32, #tpu.memory_space<vmem>>, vector<1x8x128xf32>,
    %c2_i32_47 = arith.constant 2 : i32
    %c2_i32_48 = arith.constant 2 : i32
    %107 = arith.muli %c2_i32_48, %c2_i32_47 : i32
    %c3_i32_49 = arith.constant 3 : i32
    %108 = arith.subi %c3_i32_49, %107 : i32
    %109 = arith.muli %arg0, %108 : i32
    %110 = arith.addi %c2_i32_47, %109 : i32
    %111 = arith.addi %10, %110 : i32
    %112 = arith.index_cast %110 : i32 to index
    %c0_50 = arith.constant 0 : index
    %c0_51 = arith.constant 0 : index
    %113 = vector.load %arg3[%112, %c0_50, %c0_51] : memref<4x8x512xf32, #tpu.memory_space<vmem>>, vector<1x8x512xf32>
    %114 = vector.shape_cast %113 : vector<1x8x512xf32> to vector<8x512xf32>
    %c0_52 = arith.constant 0 : index
    %c0_53 = arith.constant 0 : index
    %115 = vector.load %arg6[%c0_52, %c0_53] : memref<8x128xf32, #tpu.memory_space<vmem>>, vector<8x128xf32>
    %cst_54 = arith.constant dense<0.000000e+00> : vector<8x512xf32>
    %116 = tpu.matmul %115, %5, %cst_54 {dimension_numbers = #tpu.dot_dimension_numbers<[1], [0], [0], [1], [0, 0, 1, 1], [], []>} : vector<8x128xf32>, vector<128x512xf32>, vector<8x512xf32> -> vector<8x512xf32>
    %117 = arith.addf %114, %116 : vector<8x512xf32>
    %118 = vector.extract_strided_slice %117 {offsets = [0, 0], sizes = [8, 384], strides = [1, 1]} : vector<8x512xf32> to vector<8x384xf32>
    %119 = arith.negf %118 : vector<8x384xf32>
    %120 = math.exp %119 : vector<8x384xf32>
    %cst_55 = arith.constant 1.000000e+00 : f32
    %121 = vector.broadcast %cst_55 : f32 to vector<8x384xf32>
    %122 = arith.addf %121, %120 : vector<8x384xf32>
    %123 = arith.divf %121, %122 : vector<8x384xf32>
    %124 = vector.extract_strided_slice %123 {offsets = [0, 0], sizes = [8, 128], strides = [1, 1]} : vector<8x384xf32> to vector<8x128xf32>
    %125 = vector.extract_strided_slice %123 {offsets = [0, 128], sizes = [8, 128], strides = [1, 1]} : vector<8x384xf32> to vector<8x128xf32>
    %126 = vector.extract_strided_slice %123 {offsets = [0, 256], sizes = [8, 128], strides = [1, 1]} : vector<8x384xf32> to vector<8x128xf32>
    %127 = vector.extract_strided_slice %117 {offsets = [0, 384], sizes = [8, 128], strides = [1, 1]} : vector<8x512xf32> to vector<8x128xf32>
    %128 = math.tanh %127 : vector<8x128xf32>
    %c0_56 = arith.constant 0 : index
    %c0_57 = arith.constant 0 : index
    %129 = vector.load %arg7[%c0_56, %c0_57] : memref<8x128xf32, #tpu.memory_space<vmem>>, vector<8x128xf32>
    %130 = arith.mulf %125, %129 : vector<8x128xf32>
    %131 = arith.mulf %124, %128 : vector<8x128xf32>
    %132 = arith.addf %130, %131 : vector<8x128xf32>
    %133 = math.tanh %132 : vector<8x128xf32>
    %134 = arith.mulf %126, %133 : vector<8x128xf32>
    %135 = vector.broadcast %111 : i32 to vector<8x1xi32>
    %136 = arith.cmpi sgt, %3, %135 : vector<8x1xi32>
    %c0_58 = arith.constant 0 : index
    %c0_59 = arith.constant 0 : index
    %137 = vector.load %arg6[%c0_58, %c0_59] : memref<8x128xf32, #tpu.memory_space<vmem>>, vector<8x128xf32>
    %138 = vector.shape_cast %136 : vector<8x1xi1> to vector<8x1xi1>
    %139 = vector.broadcast %138 : vector<8x1xi1> to vector<8x128xi1>
    %140 = arith.select %139, %134, %137 : vector<8x128xi1>, vector<8x128xf32>
    %c0_60 = arith.constant 0 : index
    %c0_61 = arith.constant 0 : index
    %141 = vector.load %arg6[%c0_60, %c0_61] : memref<8x128xf32, #tpu.memory_space<vmem>>, vector<8x128xf32>
    tpu.vector_store %arg6[%c0_60, %c0_61], %140 {strides = array<i32>} : memref<8x128xf32, #tpu.memory_space<vmem>>, vector<8x128xf32>,
    %c0_62 = arith.constant 0 : index
    %c0_63 = arith.constant 0 : index
    %142 = vector.load %arg7[%c0_62, %c0_63] : memref<8x128xf32, #tpu.memory_space<vmem>>, vector<8x128xf32>
    %143 = vector.shape_cast %136 : vector<8x1xi1> to vector<8x1xi1>
    %144 = vector.broadcast %143 : vector<8x1xi1> to vector<8x128xi1>
    %145 = arith.select %144, %132, %142 : vector<8x128xi1>, vector<8x128xf32>
    %c0_64 = arith.constant 0 : index
    %c0_65 = arith.constant 0 : index
    %146 = vector.load %arg7[%c0_64, %c0_65] : memref<8x128xf32, #tpu.memory_space<vmem>>, vector<8x128xf32>
    tpu.vector_store %arg7[%c0_64, %c0_65], %145 {strides = array<i32>} : memref<8x128xf32, #tpu.memory_space<vmem>>, vector<8x128xf32>,
    %cst_66 = arith.constant 0.000000e+00 : f32
    %147 = vector.shape_cast %136 : vector<8x1xi1> to vector<8x1xi1>
    %148 = vector.broadcast %147 : vector<8x1xi1> to vector<8x128xi1>
    %149 = vector.broadcast %cst_66 : f32 to vector<8x128xf32>
    %150 = arith.select %148, %134, %149 : vector<8x128xi1>, vector<8x128xf32>
    %151 = arith.index_cast %110 : i32 to index
    %c0_67 = arith.constant 0 : index
    %c0_68 = arith.constant 0 : index
    %152 = vector.load %arg5[%151, %c0_67, %c0_68] : memref<4x8x128xf32, #tpu.memory_space<vmem>>, vector<1x8x128xf32>
    %153 = vector.shape_cast %152 : vector<1x8x128xf32> to vector<8x128xf32>
    %154 = vector.shape_cast %150 : vector<8x128xf32> to vector<1x8x128xf32>
    tpu.vector_store %arg5[%151, %c0_67, %c0_68], %154 {strides = array<i32>} : memref<4x8x128xf32, #tpu.memory_space<vmem>>, vector<1x8x128xf32>,
    %c3_i32_69 = arith.constant 3 : i32
    %c2_i32_70 = arith.constant 2 : i32
    %155 = arith.muli %c2_i32_70, %c3_i32_69 : i32
    %c3_i32_71 = arith.constant 3 : i32
    %156 = arith.subi %c3_i32_71, %155 : i32
    %157 = arith.muli %arg0, %156 : i32
    %158 = arith.addi %c3_i32_69, %157 : i32
    %159 = arith.addi %10, %158 : i32
    %160 = arith.index_cast %158 : i32 to index
    %c0_72 = arith.constant 0 : index
    %c0_73 = arith.constant 0 : index
    %161 = vector.load %arg3[%160, %c0_72, %c0_73] : memref<4x8x512xf32, #tpu.memory_space<vmem>>, vector<1x8x512xf32>
    %162 = vector.shape_cast %161 : vector<1x8x512xf32> to vector<8x512xf32>
    %c0_74 = arith.constant 0 : index
    %c0_75 = arith.constant 0 : index
    %163 = vector.load %arg6[%c0_74, %c0_75] : memref<8x128xf32, #tpu.memory_space<vmem>>, vector<8x128xf32>
    %cst_76 = arith.constant dense<0.000000e+00> : vector<8x512xf32>
    %164 = tpu.matmul %163, %5, %cst_76 {dimension_numbers = #tpu.dot_dimension_numbers<[1], [0], [0], [1], [0, 0, 1, 1], [], []>} : vector<8x128xf32>, vector<128x512xf32>, vector<8x512xf32> -> vector<8x512xf32>
    %165 = arith.addf %162, %164 : vector<8x512xf32>
    %166 = vector.extract_strided_slice %165 {offsets = [0, 0], sizes = [8, 384], strides = [1, 1]} : vector<8x512xf32> to vector<8x384xf32>
    %167 = arith.negf %166 : vector<8x384xf32>
    %168 = math.exp %167 : vector<8x384xf32>
    %cst_77 = arith.constant 1.000000e+00 : f32
    %169 = vector.broadcast %cst_77 : f32 to vector<8x384xf32>
    %170 = arith.addf %169, %168 : vector<8x384xf32>
    %171 = arith.divf %169, %170 : vector<8x384xf32>
    %172 = vector.extract_strided_slice %171 {offsets = [0, 0], sizes = [8, 128], strides = [1, 1]} : vector<8x384xf32> to vector<8x128xf32>
    %173 = vector.extract_strided_slice %171 {offsets = [0, 128], sizes = [8, 128], strides = [1, 1]} : vector<8x384xf32> to vector<8x128xf32>
    %174 = vector.extract_strided_slice %171 {offsets = [0, 256], sizes = [8, 128], strides = [1, 1]} : vector<8x384xf32> to vector<8x128xf32>
    %175 = vector.extract_strided_slice %165 {offsets = [0, 384], sizes = [8, 128], strides = [1, 1]} : vector<8x512xf32> to vector<8x128xf32>
    %176 = math.tanh %175 : vector<8x128xf32>
    %c0_78 = arith.constant 0 : index
    %c0_79 = arith.constant 0 : index
    %177 = vector.load %arg7[%c0_78, %c0_79] : memref<8x128xf32, #tpu.memory_space<vmem>>, vector<8x128xf32>
    %178 = arith.mulf %173, %177 : vector<8x128xf32>
    %179 = arith.mulf %172, %176 : vector<8x128xf32>
    %180 = arith.addf %178, %179 : vector<8x128xf32>
    %181 = math.tanh %180 : vector<8x128xf32>
    %182 = arith.mulf %174, %181 : vector<8x128xf32>
    %183 = vector.broadcast %159 : i32 to vector<8x1xi32>
    %184 = arith.cmpi sgt, %3, %183 : vector<8x1xi32>
    %c0_80 = arith.constant 0 : index
    %c0_81 = arith.constant 0 : index
    %185 = vector.load %arg6[%c0_80, %c0_81] : memref<8x128xf32, #tpu.memory_space<vmem>>, vector<8x128xf32>
    %186 = vector.shape_cast %184 : vector<8x1xi1> to vector<8x1xi1>
    %187 = vector.broadcast %186 : vector<8x1xi1> to vector<8x128xi1>
    %188 = arith.select %187, %182, %185 : vector<8x128xi1>, vector<8x128xf32>
    %c0_82 = arith.constant 0 : index
    %c0_83 = arith.constant 0 : index
    %189 = vector.load %arg6[%c0_82, %c0_83] : memref<8x128xf32, #tpu.memory_space<vmem>>, vector<8x128xf32>
    tpu.vector_store %arg6[%c0_82, %c0_83], %188 {strides = array<i32>} : memref<8x128xf32, #tpu.memory_space<vmem>>, vector<8x128xf32>,
    %c0_84 = arith.constant 0 : index
    %c0_85 = arith.constant 0 : index
    %190 = vector.load %arg7[%c0_84, %c0_85] : memref<8x128xf32, #tpu.memory_space<vmem>>, vector<8x128xf32>
    %191 = vector.shape_cast %184 : vector<8x1xi1> to vector<8x1xi1>
    %192 = vector.broadcast %191 : vector<8x1xi1> to vector<8x128xi1>
    %193 = arith.select %192, %180, %190 : vector<8x128xi1>, vector<8x128xf32>
    %c0_86 = arith.constant 0 : index
    %c0_87 = arith.constant 0 : index
    %194 = vector.load %arg7[%c0_86, %c0_87] : memref<8x128xf32, #tpu.memory_space<vmem>>, vector<8x128xf32>
    tpu.vector_store %arg7[%c0_86, %c0_87], %193 {strides = array<i32>} : memref<8x128xf32, #tpu.memory_space<vmem>>, vector<8x128xf32>,
    %cst_88 = arith.constant 0.000000e+00 : f32
    %195 = vector.shape_cast %184 : vector<8x1xi1> to vector<8x1xi1>
    %196 = vector.broadcast %195 : vector<8x1xi1> to vector<8x128xi1>
    %197 = vector.broadcast %cst_88 : f32 to vector<8x128xf32>
    %198 = arith.select %196, %182, %197 : vector<8x128xi1>, vector<8x128xf32>
    %199 = arith.index_cast %158 : i32 to index
    %c0_89 = arith.constant 0 : index
    %c0_90 = arith.constant 0 : index
    %200 = vector.load %arg5[%199, %c0_89, %c0_90] : memref<4x8x128xf32, #tpu.memory_space<vmem>>, vector<1x8x128xf32>
    %201 = vector.shape_cast %200 : vector<1x8x128xf32> to vector<8x128xf32>
    %202 = vector.shape_cast %198 : vector<8x128xf32> to vector<1x8x128xf32>
    tpu.vector_store %arg5[%199, %c0_89, %c0_90], %202 {strides = array<i32>} : memref<4x8x128xf32, #tpu.memory_space<vmem>>, vector<1x8x128xf32>,
    %c4_i32_91 = arith.constant 4 : i32
    return
  }
  func.func @transform_0(%arg0: i32, %arg1: i32) -> (i32, i32) {
    %c0_i32 = arith.constant 0 : i32
    %c0_i32_0 = arith.constant 0 : i32
    %c0_i32_1 = arith.constant 0 : i32
    return %c0_i32, %c0_i32_0 : i32, i32
  }
  func.func @transform_1(%arg0: i32, %arg1: i32) -> (i32, i32, i32) {
    %c2_i32 = arith.constant 2 : i32
    %0 = arith.muli %c2_i32, %arg1 : i32
    %c1_i32 = arith.constant 1 : i32
    %1 = arith.subi %c1_i32, %0 : i32
    %2 = arith.muli %arg0, %1 : i32
    %3 = arith.addi %arg1, %2 : i32
    %c0_i32 = arith.constant 0 : i32
    %c0_i32_0 = arith.constant 0 : i32
    return %3, %c0_i32, %arg0 : i32, i32, i32
  }
  func.func @transform_2(%arg0: i32, %arg1: i32) -> (i32, i32, i32) {
    %c0_i32 = arith.constant 0 : i32
    %c0_i32_0 = arith.constant 0 : i32
    %c0_i32_1 = arith.constant 0 : i32
    return %arg0, %c0_i32, %c0_i32_0 : i32, i32, i32
  }
  func.func @transform_3(%arg0: i32, %arg1: i32) -> (i32, i32, i32) {
    %c2_i32 = arith.constant 2 : i32
    %0 = arith.muli %c2_i32, %arg1 : i32
    %c1_i32 = arith.constant 1 : i32
    %1 = arith.subi %c1_i32, %0 : i32
    %2 = arith.muli %arg0, %1 : i32
    %3 = arith.addi %arg1, %2 : i32
    %c0_i32 = arith.constant 0 : i32
    %c0_i32_0 = arith.constant 0 : i32
    return %3, %c0_i32, %arg0 : i32, i32, i32
  }
}

</mosaic_0001>

<bundles_post_ra>
// kernel: tpu_custom_call.1
= control target key start
LH: loop header
LB: loop body
LE: loop exit
PB: predicated region body
PF: predicated region fallthrough
CT: control target
= control target key end

     0   :  { %s2593_s0 = inlined_call_operand.vmem [shape: s32[8,1], index: 0, kind: input, shape index: {}]   ;;  %s2594_s1 = inlined_call_operand.hbm [shape: f32[8,8,1024], index: 1, kind: input, shape index: {}]   ;;  %s2595_s2 = inlined_call_operand.hbm [shape: f32[2,128,512], index: 2, kind: input, shape index: {}]   ;;  %s2596_s3 = inlined_call_operand.hbm [shape: f32[8,8,256], index: 3, kind: output, shape index: {}]  }
   0x1   :  { %2655 = sst [smem:[#allocation38_spill]] %s2594_s1 }
   0x2   :  { %2656 = sst [smem:[#allocation39_spill]] %s2596_s3 }
   0x3   :  { %8 = vsyncpa [#allocation5], 0 }
   0x4   :  { %10 = vsyncpa [#allocation5 + $0x1], 0 }
   0x5   :  { %11 = vsyncpa [#allocation8], 0 }
   0x6   :  { %13 = vsyncpa [#allocation8 + $0x1], 0 }
   0x7   :  { %14 = vsyncpa [#allocation6], 0 }
   0x8   :  { %16 = vsyncpa [#allocation6 + $0x1], 0  ;;  %s1764_s12 = smov 0   ;;  %s1766_s13 = smov 0  }
   0x9   :  { %s1768_s14 = smov 0   ;;  %s1770_s15 = smov 0  }
   0xa   :  { %s1772_s16 = smov 0   ;;  %s1774_s17 = smov 0  }
   0xb   :  { %s1776_s18 = smov 0   ;;  %s1778_s19 = smov 0  }
   0xc   :  { %s1780_s20 = smov 0   ;;  %s1782_s21 = smov 0  }
   0xd   :  { %s1784_s22 = smov 0  }
   0xe LB: > { %2657 = sst [smem:[#allocation13_spill]] %s1722_s20  ;;  %s2597_s23 = sadd.s32 4294967295, %s1730_s22   ;;  %s1730_s22 = sphi %s1784_s22, %s22_s22   ;;  %s1726_s21 = sphi %s1782_s21, %s2761_s21   ;;  %s1722_s20 = sphi %s1780_s20, %s2752_s20   ;;  %s1718_s19 = sphi %s1778_s19, %s2760_s19   ;;  %s1714_s18 = sphi %s1776_s18, %s2751_s18   ;;  %s1710_s17 = sphi %s1774_s17, %s2759_s17   ;;  %s1706_s16 = sphi %s1772_s16, %s2758_s16   ;;  %s1702_s15 = sphi %s1770_s15, %s2757_s15   ;;  %s1698_s14 = sphi %s1768_s14, %s2756_s14   ;;  %s1694_s13 = sphi %s1766_s13, %s2755_s13   ;;  %s1690_s12 = sphi %s1764_s12, %s2754_s12  }
   0xf   : > { %s1301_s24 = sadd.s32 4294967294, %s1730_s22   ;;  %s31_s25 = sadd.s32 1, %s1722_s20 }
  0x10   : > { %s34_s26 = sadd.s32 1, %s1726_s21  ;;  %p32_p0 = scmp.ge.s32.totalorder %s31_s25, 2 }
  0x11   : > { %s1302_s27 = sshll.u32 %s1722_s20, 1  ;;  %s72_s29 = sadd.s32 1, %s1710_s17 }
  0x12   : > { %s60_s28 = ssub.s32 1, %s1302_s27  ;;  %s2763_s25 = smov (%p32_p0, %s31_s25), 0 }
  0x13   : > { %2658 = sst [smem:[#allocation14_spill]] %s2763_s25  ;;  %s2765_s26 = smov (!%p32_p0, %s34_s26), %s1726_s21 }
  0x14   : > { %s61_s30 = smul.u32 %s1726_s21, %s60_s28  ;;  %s1303_s4 = sshll.u32 %s2763_s25, 1 }
  0x15   : > { %p36_p1 = scmp.ge.s32.totalorder %s2765_s26, 2  ;;  %s64_s5 = ssub.s32 1, %s1303_s4 }
  0x16   : > { %s62_s6 = sadd.s32 %s1722_s20, %s61_s30  ;;  %p79_p2 = scmp.ne.s32.totalorder %s1710_s17, %s1706_s16 }
  0x17   : > { %s2767_s26 = smov (%p36_p1, %s2765_s26), 0  ;;  %p2603_p3 = scmp.eq.s32.totalorder %s1730_s22, 0 }
  0x18   : > { %2659 = sst [smem:[#allocation15_spill]] %s2767_s26  ;;  %p2604_p4 = scmp.ne.s32.totalorder %s1706_s16, %s1702_s15 }
  0x19   : > { %s65_s7 = smul.u32 %s64_s5, %s2767_s26  ;;  %s1841_s8 = ssub.s32 %s1726_s21, %s2767_s26 }
  0x1a   : > { %p1848_p5 = por %p2603_p3, %p79_p2  ;;  %p145_p7 = scmp.eq.s32.totalorder %s2597_s23, 3 }
  0x1b   : > { %s66_s10 = sadd.s32 %s65_s7, %s2763_s25  ;;  %p151_p8 = scmp.eq.s32.totalorder %s1301_s24, 3 }
  0x1c   : > { %s67_s11 = ssub.s32 %s62_s6, %s66_s10  ;;  %p1860_p9 = por %p145_p7, %p79_p2 }
  0x1d   : > { %s69_s27 = sor.u32 %s1841_s8, %s67_s11  ;;  %p1867_p11 = por %p151_p8, %p2604_p4 }
  0x1e   : > { %s2661_s28 = scalar_select %p1860_p9, 1, 0 }
  0x1f   : > { %p70_p10 = scmp.eq.s32.totalorder %s69_s27, 0  ;;  %p2602_p12 = scmp.lt.s32.totalorder %s1730_s22, 4 }
  0x20   : > { %s2662_s30 = scalar_select %p1867_p11, 1, 0 }
  0x21   : > { %s1873_s4 = scalar_select %p70_p10, %s1710_s17, %s72_s29  }
  0x22   : > { %s174_s5 = sand.u32 1, %s1710_s17   ;;  %s1311_s7 = sshll.u32 %s1726_s21, 2 }
  0x23   : > { %s1308_s24 = sshll.u32 %s174_s5, 7  ;;  %s1363_s10 = sshll.u32 %s62_s6, 5 }
  0x24   : > { %s189_s11 = sadd.s32 %s1363_s10, %s1311_s7  ;;  %s178_s23 = scalar_lea.vmem [#allocation4], %s1308_s24 }
  0x25   : > { %s192_s26 = sshll.u32 %s178_s23, 4  ;;  %s1313_s25 = sshll.u32 %s189_s11, 7  ;;  %s1877_s26 = int_to_ptr.vmem [resolvable:$true] %s192_s26 }
  0x26   : > { %s2663_s1 = sld [smem:[#allocation38_spill]]  ;;  %p1888_p13 = pnand %p2602_p12, %p1848_p5 }
  0x27   : > { %s1892_s6 = scalar_lea.sflag [#allocation5], %s174_s5 }
  0x28   : > { %p1552_p1 = pneg %p1888_p13 }
  0x2c   : > { %s1882_s3 = scalar_lea.hbm %s2663_s1, %s1313_s25  ;;  %s1555_s9 = scalar_lea.hbm %s2663_s1, 8192 }
  0x2d   : > { %s1550_s23 = scalar_lea.hbm %s1882_s3, 2048  ;;  %p1556_p5 = scmp.lt.s32.totalorder %s1882_s3, %s2663_s1 }
  0x2e   : > { %p1551_p0 = scmp.ne.s32.totalorder %s1882_s3, %s1550_s23  ;;  %p1557_p8 = scmp.lt.s32.totalorder %s1555_s9, %s1550_s23 }
  0x30   : > { %p1553_p2 = pnand %p1552_p1, %p1551_p0  ;;  %p1558_p10 = por %p1557_p8, %p1556_p5 }
  0x32   : > { %p1554_p7 = pneg %p1553_p2 }
  0x34   : > { %p1559_p12 = pnand %p1558_p10, %p1554_p7 }
  0x36   : > { %1562 = shalt.err (!%p1559_p12)
}
  0x37   : > { %s1563_s5 = scalar_lea.vmem %s1877_s26, 2048  ;;  %s1732_s10 = smov [#allocation4]  }
  0x38   : > { %p1564_p3 = scmp.ne.s32.totalorder %s1877_s26, %s1563_s5  ;;  %s1568_s11 = sshll.u32 %s1732_s10, 4  ;;  %s1569_s11 = int_to_ptr.vmem [resolvable:$false] %s1568_s11 }
  0x39   : > { %s1570_s27 = scalar_lea.vmem %s1569_s11, 4096  ;;  %p1571_p2 = scmp.lt.s32.totalorder %s1877_s26, %s1569_s11 }
  0x3a   : > { %p1566_p6 = pnand %p1564_p3, %p1552_p1  ;;  %p1572_p4 = scmp.lt.s32.totalorder %s1570_s27, %s1563_s5 }
  0x3c   : > { %p1567_p0 = pneg %p1566_p6  ;;  %p1573_p11 = por %p1572_p4, %p1571_p2 }
  0x3e   : > { %p1574_p9 = pnand %p1573_p11, %p1567_p0 }
  0x40   : > { %1577 = shalt.err (!%p1574_p9)
}
  0x41   : > { %s1733_s23 = smov 1024   ;;  %s2606_s20 = smov 512  }
  0x42   : > { %s2607_s25 = smov 32   ;;  %p1317_p3 = scmp.ge.s32.totalorder %s1730_s22, 1 }
  0x43   : > { %1377 = dma.hbm_to_vmem [thread:$0]  (!%p1888_p13), %s1882_s3, 2048, %s1877_s26, %s1892_s6, %s1733_s23, %s2606_s20, %s2607_s25  }
  0x44   : > { %p221_p4 = scmp.lt.s32.totalorder %s1730_s22, 5  ;;  %s2666_s7 = sadd.s32 4294967295, %s1730_s22  }
  0x45   : > { %p86_p9 = scmp.eq.s32.totalorder %s2666_s7, 0  ;;  %s98_s24 = sadd.s32 1, %s1698_s14 }
  0x46   : > { %p1917_p6 = pnand %p1317_p3, %p221_p4  ;;  %p105_p11 = scmp.ne.s32.totalorder %s1698_s14, %s1694_s13 }
  0x47   : > { %p2667_p12 = scmp.ne.s32.totalorder %s1706_s16, %s1702_s15  ;;  %p111_p7 = scmp.ne.s32.totalorder %s1694_s13, %s1690_s12 }
  0x48   : > { %p2669_p5 = scmp.eq.s32.totalorder %s1841_s8, 0  ;;  %p2670_p13 = scmp.eq.s32.totalorder %s1730_s22, 0 }
  0x49   : > { %p1929_p1 = por %p86_p9, %p2667_p12  ;;  %p1942_p10 = por %p111_p7, %p86_p9 }
  0x4a   : > { %s1938_s29 = scalar_select %p2669_p5, %s1698_s14, %s98_s24  }
  0x4b   : > { %p107_p8 = por %p105_p11, %p2670_p13  ;;  %s202_s26 = sand.u32 1, %s1698_s14  }
  0x4c   : > { %s1364_s6 = sshll.u32 %s1726_s21, 13  ;;  %s1314_s10 = sshll.u32 %s202_s26, 9 }
  0x4d   : > { %s212_s23 = scalar_lea.hbm %s2595_s2, %s1364_s6  ;;  %s206_s7 = scalar_lea.vmem [#allocation7], %s1314_s10 }
  0x4e   : > { %s213_s20 = sshll.u32 %s206_s7, 4  ;;  %p2672_p0 = scmp.lt.s32.totalorder %s1730_s22, 4  ;;  %s214_s20 = int_to_ptr.vmem [resolvable:$true] %s213_s20 }
  0x4f   : > { %s203_s8 = scalar_lea.sflag [#allocation8], %s202_s26  ;;  %s1591_s24 = scalar_lea.vmem %s214_s20, 8192 }
  0x50   : > { %p1953_p2 = pnand %p2672_p0, %p107_p8  ;;  %p1592_p4 = scmp.ne.s32.totalorder %s214_s20, %s1591_s24 }
  0x51   : > { %s1736_s25 = smov [#allocation7]  }
  0x52   : > { %p1580_p3 = pneg %p1953_p2  ;;  %s1596_s1 = sshll.u32 %s1736_s25, 4  ;;  %s1597_s1 = int_to_ptr.vmem [resolvable:$false] %s1596_s1 }
  0x53   : > { %s1598_s6 = scalar_lea.vmem %s1597_s1, 16384  ;;  %p1599_p12 = scmp.lt.s32.totalorder %s214_s20, %s1597_s1 }
  0x54   : > { %p1594_p9 = pnand %p1592_p4, %p1580_p3  ;;  %p1600_p7 = scmp.lt.s32.totalorder %s1598_s6, %s1591_s24 }
  0x56   : > { %p1595_p11 = pneg %p1594_p9  ;;  %p1601_p5 = por %p1600_p7, %p1599_p12 }
  0x58   : > { %p1602_p13 = pnand %p1601_p5, %p1595_p11 }
  0x5a   : > { %1605 = shalt.err (!%p1602_p13)
}
  0x5b   : > { %s2674_s10 = smov 32   ;;  %s2675_s11 = smov 512  }
  0x5c   : > { %1380 = dma.hbm_to_vmem [thread:$0]  (!%p1953_p2), %s212_s23, 8192, %s214_s20, %s203_s8, %s2675_s11, %s2675_s11, %s2674_s10  }
  0x5d   : > { %225 = sbr.rel (%p1917_p6) target bundleno = 1163 (0x48b), region = 32 }
  0x62   : > { %s1967_s26 = sand.u32 1, %s1706_s16  }
  0x63   : > { %s1318_s1 = sshll.u32 %s1967_s26, 7  ;;  %s228_s25 = scalar_lea.sflag [#allocation5], %s1967_s26 }
  0x64   : > { %s1971_s27 = scalar_lea.vmem [#allocation4], %s1318_s1 }
  0x65   : > { %1677 = dma.done.wait (%p1929_p1), %s228_s25, 2048  }
  0x66   : > { %1679 = vsyncadd (%p1929_p1), %s228_s25, 4294965248  ;;  %s236_s20 = sand.u32 1, %s1694_s13  }
  0x67   : > { %s1319_s9 = sshll.u32 %s236_s20, 9  ;;  %s237_s23 = scalar_lea.sflag [#allocation8], %s236_s20 }
  0x68   : > { %s1978_s7 = scalar_lea.vmem [#allocation7], %s1319_s9 }
  0x69   : > { %1681 = dma.done.wait (%p1942_p10), %s237_s23, 8192  }
  0x6a   : > { %1683 = vsyncadd (%p1942_p10), %s237_s23, 4294959104  ;;  %s1320_s12 = sshll.u32 %s1967_s26, 5  ;;  %p1321_p6 = scmp.ne.s32.totalorder %s1714_s18, 0 }
  0x6b   : > { %s1985_s8 = scalar_lea.vmem [#allocation9], %s1320_s12 }
  0x6c   : > { %282 = sbr.rel (%p1321_p6) target bundleno = 115 (0x73), region = 44 }
  0x71   : > { %v1737_v0 = vmov 0.0  }
  0x72   : > { %283 = vst [vmem:[#allocation2] sm:$0xff] %v1737_v0  ;;  %284 = vst [vmem:[#allocation3] sm:$0xff] %v1737_v0 }
  0x73 PF: > { %v1989_v1 = vld [vmem:[%s1978_s7 + $0x1e8] sm:$0xff]  ;;  %v1992_v2 = vld [vmem:[%s1978_s7 + $0x1e0] sm:$0xff]  ;;  %v2608_v5 = vmov 0.0   ;;  %v2610_v8 = vmov 0   ;;  %v2022_v11 = vld [vmem:[%s1978_s7 + $0x1f8] sm:$0xff]  ;;  %s1322_s5 = sshll.u32 %s1714_s18, 1 }
  0x74   : > { %2676 = vst [vmem:[#allocation16_spill] sm:$0xff] %v1989_v1  ;;  %v1995_v3 = vld [vmem:[%s1978_s7 + $0x1c8] sm:$0xff]  ;;  %365 = vmatprep.subr.mxu0 %v1989_v1  ;;  %v1999_v4 = vld [vmem:[%s1978_s7 + $0x1c0] sm:$0xff]  ;;  %429 = vmatprep.mubr.f32.mxu0 %v2608_v5  ;;  %2677 = vst [vmem:[#allocation17_spill] sm:$0xff] %v2022_v11  ;;  %s2063_s3 = ssub.s32 1, %s1322_s5  ;;  %s552_s1 = sadd.s32 1, %s1718_s19 }
  0x75   : > { %366 = vmatpush1.msra.mxu0 %v1992_v2  ;;  %v2004_v6 = vld [vmem:[%s1978_s7 + $0x1a8] sm:$0xff]  ;;  %500 = vmatprep.mubr.f32.mxu1 %v2608_v5  ;;  %v2009_v7 = vld [vmem:[%s1978_s7 + $0x1a0] sm:$0xff]  ;;  %v2030_v13 = vld [vmem:[%s1978_s7 + $0x1f0] sm:$0xff]  ;;  %s352_s24 = smul.u32 %s1718_s19, %s2063_s3  ;;  %s2422_s3 = ssub.s32 2, %s1718_s19 }
  0x76   : > { %367 = vmatprep.subr.mxu0 %v1995_v3  ;;  %1484 = vset.pattern.permute.xlu0 %v2610_v8  ;;  %v2014_v9 = vld [vmem:[%s1978_s7 + $0x188] sm:$0xff]  ;;  %v2019_v10 = vld [vmem:[%s1978_s7 + $0x180] sm:$0xff]  ;;  %v2039_v15 = vld [vmem:[%s1978_s7 + $0x1d8] sm:$0xff]  ;;  %s1365_s23 = smul.u32 96, %s1718_s19  ;;  %s1330_s25 = sshll.u32 %s1718_s19, 5 }
  0x77   : > { %368 = vmatpush1.msra.mxu0 %v1999_v4  ;;  %1485 = vset.pattern.permute.xlu1 %v2610_v8  ;;  %v2026_v12 = vld [vmem:[%s1978_s7 + $0x168] sm:$0xff]  ;;  %v2035_v14 = vld [vmem:[%s1978_s7 + $0x160] sm:$0xff]  ;;  %v2042_v16 = vld [vmem:[%s1978_s7 + $0x1d0] sm:$0xff]  ;;  %s2124_s6 = sadd.s32 %s1714_s18, %s352_s24  ;;  %s355_s18 = smul.u32 3, %s1718_s19 }
  0x78   : > { %369 = vmatprep.subr.mxu0 %v2004_v6  ;;  %436 = vmatprep.subr.mxu1 %v2022_v11  ;;  %v2046_v17 = vld [vmem:[%s1978_s7 + $0x148] sm:$0xff]  ;;  %v2050_v18 = vld [vmem:[%s1978_s7 + $0x1b8] sm:$0xff]  ;;  %v2054_v19 = vld [vmem:[%s1978_s7 + $0x140] sm:$0xff]  ;;  %s2152_s10 = sshll.u32 %s2124_s6, 2  ;;  %s1329_s12 = smul.u32 24, %s1718_s19 }
  0x79   : > { %370 = vmatpush1.msra.mxu0 %v2009_v7  ;;  %437 = vmatpush1.msra.mxu1 %v2030_v13  ;;  %v2058_v20 = vld [vmem:[%s1978_s7 + $0x1b0] sm:$0xff]  ;;  %v2061_v21 = vld [vmem:[%s1978_s7 + $0x198] sm:$0xff]  ;;  %v2067_v22 = vld [vmem:[%s1978_s7 + $0x128] sm:$0xff]  ;;  %s356_s11 = sadd.s32 %s2152_s10, %s355_s18  ;;  %s553_s9 = sadd.s32 %s2152_s10, %s552_s1 }
  0x7a   : > { %371 = vmatprep.subr.mxu0 %v2014_v9  ;;  %438 = vmatprep.subr.mxu1 %v2039_v15  ;;  %v2071_v23 = vld [vmem:[%s1978_s7 + $0x190] sm:$0xff]  ;;  %v2075_v24 = vld [vmem:[%s1978_s7 + $0x120] sm:$0xff]  ;;  %v2079_v25 = vld [vmem:[%s1978_s7 + $0x178] sm:$0xff]  ;;  %v536_v55 = vstv %s356_s11  ;;  %s550_s5 = scalar_lea.vmem %s1985_s8, %s1329_s12 [#allocation9]  ;;  %s946_s24 = smul.u32 4294967293, %s1718_s19 }
  0x7b   : > { %372 = vmatpush1.msra.mxu0 %v2019_v10  ;;  %439 = vmatpush1.msra.mxu1 %v2042_v16  ;;  %v2083_v26 = vld [vmem:[%s1978_s7 + $0x108] sm:$0xff]  ;;  %v2087_v27 = vld [vmem:[%s1978_s7 + $0x170] sm:$0xff]  ;;  %v2093_v28 = vld [vmem:[%s1978_s7 + $0x100] sm:$0xff]  ;;  %v733_v0 = vstv %s553_s9  ;;  %s750_s18 = sadd.s32 %s2152_s10, %s2422_s3  ;;  %s1228_s20 = scalar_lea.vmem %s1971_s27, %s1330_s25 [#allocation4] }
  0x7c   : > { %373 = vmatprep.subr.mxu0 %v2026_v12  ;;  %440 = vmatprep.subr.mxu1 %v2050_v18  ;;  %v2097_v29 = vld [vmem:[%s1978_s7 + $0x158] sm:$0xff]  ;;  %v2101_v30 = vld [vmem:[%s1978_s7 + $0xe8] sm:$0xff]  ;;  %v2105_v31 = vld [vmem:[%s1978_s7 + $0x150] sm:$0xff]  ;;  %s947_s11 = sadd.s32 3, %s946_s24  ;;  %s1345_s12 = sshll.u32 %s2422_s3, 3 }
  0x7d   : > { %374 = vmatpush1.msra.mxu0 %v2035_v14  ;;  %441 = vmatpush1.msra.mxu1 %v2058_v20  ;;  %v2109_v32 = vld [vmem:[%s1978_s7 + $0xe0] sm:$0xff]  ;;  %v2113_v33 = vld [vmem:[%s1978_s7 + $0x138] sm:$0xff]  ;;  %v2117_v34 = vld [vmem:[%s1978_s7 + $0xc8] sm:$0xff]  ;;  %s948_s1 = sadd.s32 %s2152_s10, %s947_s11  ;;  %s1338_s10 = sshll.u32 %s1718_s19, 3 }
  0x7e   : > { %375 = vmatprep.subr.mxu0 %v2046_v17  ;;  %442 = vmatprep.subr.mxu1 %v2061_v21  ;;  %v2121_v35 = vld [vmem:[%s1978_s7 + $0x130] sm:$0xff]  ;;  %v2128_v36 = vld [vmem:[%s1978_s7 + $0xc0] sm:$0xff]  ;;  %v2132_v37 = vld [vmem:[%s1978_s7 + $0x118] sm:$0xff]  ;;  %s1231_s9 = scalar_lea.vmem %s1985_s8, %s1338_s10 [#allocation9]  ;;  %s1346_s24 = smul.u32 4294967200, %s1718_s19 }
  0x7f   : > { %376 = vmatpush1.msra.mxu0 %v2054_v19  ;;  %443 = vmatpush1.msra.mxu1 %v2071_v23  ;;  %v2136_v38 = vld [vmem:[%s1978_s7 + $0xa8] sm:$0xff]  ;;  %v2140_v39 = vld [vmem:[%s1978_s7 + $0x110] sm:$0xff]  ;;  %v2145_v40 = vld [vmem:[%s1978_s7 + $0xa0] sm:$0xff]  ;;  %s1164_s25 = sshll.u32 %s1985_s8, 4  ;;  %p2749_p8 = scmp.ne.s32.totalorder %s2661_s28, 0  ;;  %s2529_s25 = int_to_ptr.vmem [resolvable:$true] %s1164_s25 }
  0x80   : > { %377 = vmatprep.subr.mxu0 %v2067_v22  ;;  %444 = vmatprep.subr.mxu1 %v2079_v25  ;;  %v2149_v41 = vld [vmem:[%s1978_s7 + $0xf8] sm:$0xff]  ;;  %v2156_v42 = vld [vmem:[%s1978_s7 + $0x88] sm:$0xff]  ;;  %v2160_v43 = vld [vmem:[%s1978_s7 + $0xf0] sm:$0xff] }
  0x81   : > { %378 = vmatpush1.msra.mxu0 %v2075_v24  ;;  %445 = vmatpush1.msra.mxu1 %v2087_v27  ;;  %v2164_v44 = vld [vmem:[%s1978_s7 + $0x80] sm:$0xff]  ;;  %v2168_v45 = vld [vmem:[%s1978_s7 + $0xd8] sm:$0xff]  ;;  %v2172_v46 = vld [vmem:[%s1978_s7 + $0x68] sm:$0xff] }
  0x82   : > { %379 = vmatprep.subr.mxu0 %v2083_v26  ;;  %446 = vmatprep.subr.mxu1 %v2097_v29  ;;  %2678 = vst [vmem:[#allocation18_spill] sm:$0xff] %v2164_v44  ;;  %2679 = vst [vmem:[#allocation19_spill] sm:$0xff] %v2172_v46  ;;  %v2176_v47 = vld [vmem:[%s1978_s7 + $0xd0] sm:$0xff]  ;;  %v2181_v48 = vld [vmem:[%s1978_s7 + $0x60] sm:$0xff] }
  0x83   : > { %380 = vmatpush1.msra.mxu0 %v2093_v28  ;;  %447 = vmatpush1.msra.mxu1 %v2105_v31  ;;  %2680 = vst [vmem:[#allocation20_spill] sm:$0xff] %v2181_v48  ;;  %v2185_v49 = vld [vmem:[%s1978_s7 + $0xb8] sm:$0xff]  ;;  %v2190_v50 = vld [vmem:[%s1978_s7 + $0x48] sm:$0xff]  ;;  %v2194_v51 = vld [vmem:[%s1978_s7 + $0xb0] sm:$0xff] }
  0x84   : > { %381 = vmatprep.subr.mxu0 %v2101_v30  ;;  %448 = vmatprep.subr.mxu1 %v2113_v33  ;;  %2681 = vst [vmem:[#allocation21_spill] sm:$0xff] %v2190_v50  ;;  %v2198_v52 = vld [vmem:[%s1978_s7 + $0x40] sm:$0xff]  ;;  %v2202_v53 = vld [vmem:[%s1978_s7 + $0x98] sm:$0xff]  ;;  %v2207_v54 = vld [vmem:[%s2593_s0] sm:$0xff] }
  0x85   : > { %382 = vmatpush1.msra.mxu0 %v2109_v32  ;;  %449 = vmatpush1.msra.mxu1 %v2121_v35  ;;  %2682 = vst [vmem:[#allocation22_spill] sm:$0xff] %v2198_v52  ;;  %2683 = vst [vmem:[#allocation23_spill] sm:$0xff] %v2202_v53  ;;  %v2211_v56 = vld [vmem:[%s1978_s7 + $0x28] sm:$0xff]  ;;  %v2215_v57 = vld [vmem:[%s1978_s7 + $0x90] sm:$0xff]  ;;  %vm537_vm0 = vcmp.gt.s32.totalorder %v2207_v54, %v536_v55  ;;  %vm734_vm1 = vcmp.gt.s32.totalorder %v2207_v54, %v733_v0 }
  0x86   : > { %383 = vmatprep.subr.mxu0 %v2117_v34  ;;  %450 = vmatprep.subr.mxu1 %v2132_v37  ;;  %2684 = vst [vmem:[#allocation24_spill] sm:$0xff] %v2207_v54  ;;  %2685 = vst [vmem:[#allocation25_spill] sm:$0xff] %v2211_v56  ;;  %v2220_v58 = vld [vmem:[%s1978_s7 + $0x20] sm:$0xff]  ;;  %v2224_v59 = vld [vmem:[%s1978_s7 + $0x78] sm:$0xff] }
  0x87   : > { %384 = vmatpush1.msra.mxu0 %v2128_v36  ;;  %451 = vmatpush1.msra.mxu1 %v2140_v39  ;;  %2686 = vst [vmem:[#allocation26_spill] sm:$0xff] %v2215_v57  ;;  %2687 = vst [vmem:[#allocation27_spill] sm:$0xff] %v2220_v58  ;;  %v2228_v60 = vld [vmem:[%s1978_s7 + $0x8] sm:$0xff]  ;;  %v2232_v61 = vld [vmem:[%s1978_s7 + $0x70] sm:$0xff] }
  0x88   : > { %385 = vmatprep.subr.mxu0 %v2136_v38  ;;  %452 = vmatprep.subr.mxu1 %v2149_v41  ;;  %2688 = vst [vmem:[#allocation28_spill] sm:$0xff] %v2224_v59  ;;  %2689 = vst [vmem:[#allocation29_spill] sm:$0xff] %v2228_v60  ;;  %v2237_v62 = vld [vmem:[%s1978_s7] sm:$0xff]  ;;  %v2241_v63 = vld [vmem:[%s1978_s7 + $0x58] sm:$0xff] }
  0x89   : > { %386 = vmatpush1.msra.mxu0 %v2145_v40  ;;  %453 = vmatpush1.msra.mxu1 %v2160_v43  ;;  %2690 = vst [vmem:[#allocation30_spill] sm:$0xff] %v2232_v61  ;;  %2691 = vst [vmem:[#allocation31_spill] sm:$0xff] %v2237_v62  ;;  %v2244_v5 = vld [vmem:[#allocation2] sm:$0xff]  ;;  %v2253_v55 = vld [vmem:[%s1978_s7 + $0x38] sm:$0xff] }
  0x8a   : > { %387 = vmatprep.subr.mxu0 %v2156_v42  ;;  %454 = vmatprep.subr.mxu1 %v2168_v45  ;;  %2692 = vst [vmem:[#allocation32_spill] sm:$0xff] %v2241_v63  ;;  %v2248_v8 = vld [vmem:[%s1978_s7 + $0x50] sm:$0xff]  ;;  %2694 = vst [vmem:[#allocation34_spill] sm:$0xff] %v2253_v55 }
  0x8b   : > { %388 = vmatpush1.msra.mxu0 %v2164_v44  ;;  %455 = vmatpush1.msra.mxu1 %v2176_v47  ;;  %2693 = vst [vmem:[#allocation33_spill] sm:$0xff] %v2248_v8 }
  0x8c   : > { %389 = vmatprep.subr.mxu0 %v2172_v46  ;;  %456 = vmatprep.subr.mxu1 %v2185_v49 }
  0x8d   : > { %390 = vmatpush1.msra.mxu0 %v2181_v48  ;;  %457 = vmatpush1.msra.mxu1 %v2194_v51  ;;  %v2701_v0 = vld [vmem:[#allocation25_spill] sm:$0xff] }
  0x8e   : > { %391 = vmatprep.subr.mxu0 %v2190_v50  ;;  %458 = vmatprep.subr.mxu1 %v2202_v53 }
  0x8f   : > { %392 = vmatpush1.msra.mxu0 %v2198_v52  ;;  %459 = vmatpush1.msra.mxu1 %v2215_v57  ;;  %v2703_v54 = vld [vmem:[#allocation29_spill] sm:$0xff] }
  0x90   : > { %393 = vmatprep.subr.mxu0 %v2211_v56  ;;  %460 = vmatprep.subr.mxu1 %v2224_v59  ;;  %v2695_v56 = vmov 0   ;;  %v2265_v59 = vld [vmem:[%s1978_s7 + $0x18] sm:$0xff] }
  0x91   : > { %394 = vmatpush1.msra.mxu0 %v2220_v58  ;;  %461 = vmatpush1.msra.mxu1 %v2232_v61  ;;  %v538_v52 = vsel %vm537_vm0, 1, %v2695_v56  ;;  %v2259_v58 = vld [vmem:[%s1978_s7 + $0x30] sm:$0xff]  ;;  %2697 = vst [vmem:[#allocation36_spill] sm:$0xff] %v2265_v59 }
  0x92   : > { %395 = vmatprep.subr.mxu0 %v2228_v60  ;;  %462 = vmatprep.subr.mxu1 %v2241_v63  ;;  %2696 = vst [vmem:[#allocation35_spill] sm:$0xff] %v2259_v58  ;;  %v2269_v60 = vld [vmem:[%s1978_s7 + $0x10] sm:$0xff]  ;;  %s359_s7 = scalar_lea.vmem %s1971_s27, %s1365_s23 [#allocation4]  ;;  %s1366_s23 = sshll.u32 %s2422_s3, 5 }
  0x93   : > { %396 = vmatpush1.msra.mxu0 %v2237_v62  ;;  %463 = vmatpush1.msra.mxu1 %v2248_v8  ;;  %2698 = vst [vmem:[#allocation37_spill] sm:$0xff] %v2269_v60  ;;  %v735_v62 = vsel %vm734_vm1, 1, %v2695_v56  ;;  %v2702_v56 = vld [vmem:[#allocation27_spill] sm:$0xff] }
  0x94   : > { %430 = vmatmul.mubr.f32.vlgmr.msra.gmra.mxu0 %v2244_v5  ;;  %464 = vmatprep.subr.mxu1 %v2253_v55 }
  0x95   : > { %540 = vperm.xlu0 %1484, %v538_v52   ;;  %465 = vmatpush1.msra.mxu1 %v2259_v58  ;;  %v2699_v52 = vld [vmem:[#allocation28_spill] sm:$0xff] }
  0x96   : > { %562 = vmatprep.subr.mxu0 %v1989_v1  ;;  %466 = vmatprep.subr.mxu1 %v2265_v59 }
  0x97   : > { %563 = vmatpush1.msra.mxu0 %v1992_v2  ;;  %467 = vmatpush1.msra.mxu1 %v2269_v60 }
  0x98   : > { %564 = vmatprep.subr.mxu0 %v1995_v3  ;;  %501 = vmatmul.mubr.f32.vlgmr.msra.gmra.mxu1 %v2244_v5 }
  0x99   : > { %737 = vperm.xlu0 %1484, %v735_v62   ;;  %633 = vmatprep.subr.mxu1 %v2022_v11  ;;  %v2700_v62 = vld [vmem:[#allocation22_spill] sm:$0xff] }
  0x9a   : > { %565 = vmatpush1.msra.mxu0 %v1999_v4  ;;  %634 = vmatpush1.msra.mxu1 %v2030_v13 }
  0x9b   : > { %566 = vmatprep.subr.mxu0 %v2004_v6  ;;  %635 = vmatprep.subr.mxu1 %v2039_v15 }
  0x9c   : > { %567 = vmatpush1.msra.mxu0 %v2009_v7  ;;  %636 = vmatpush1.msra.mxu1 %v2042_v16 }
  0x9d   : > { %568 = vmatprep.subr.mxu0 %v2014_v9  ;;  %637 = vmatprep.subr.mxu1 %v2050_v18 }
  0x9e   : > { %569 = vmatpush1.msra.mxu0 %v2019_v10  ;;  %638 = vmatpush1.msra.mxu1 %v2058_v20 }
  0x9f   : > { %570 = vmatprep.subr.mxu0 %v2026_v12  ;;  %639 = vmatprep.subr.mxu1 %v2061_v21 }
  0xa0   : > { %571 = vmatpush1.msra.mxu0 %v2035_v14  ;;  %640 = vmatpush1.msra.mxu1 %v2071_v23 }
  0xa1   : > { %572 = vmatprep.subr.mxu0 %v2046_v17  ;;  %641 = vmatprep.subr.mxu1 %v2079_v25 }
  0xa2   : > { %573 = vmatpush1.msra.mxu0 %v2054_v19  ;;  %642 = vmatpush1.msra.mxu1 %v2087_v27 }
  0xa3   : > { %574 = vmatprep.subr.mxu0 %v2067_v22  ;;  %643 = vmatprep.subr.mxu1 %v2097_v29 }
  0xa4   : > { %575 = vmatpush1.msra.mxu0 %v2075_v24  ;;  %644 = vmatpush1.msra.mxu1 %v2105_v31 }
  0xa5   : > { %576 = vmatprep.subr.mxu0 %v2083_v26  ;;  %645 = vmatprep.subr.mxu1 %v2113_v33 }
  0xa6   : > { %577 = vmatpush1.msra.mxu0 %v2093_v28  ;;  %646 = vmatpush1.msra.mxu1 %v2121_v35 }
  0xa7   : > { %578 = vmatprep.subr.mxu0 %v2101_v30  ;;  %647 = vmatprep.subr.mxu1 %v2132_v37 }
  0xa8   : > { %579 = vmatpush1.msra.mxu0 %v2109_v32  ;;  %648 = vmatpush1.msra.mxu1 %v2140_v39 }
  0xa9   : > { %580 = vmatprep.subr.mxu0 %v2117_v34  ;;  %649 = vmatprep.subr.mxu1 %v2149_v41 }
  0xaa   : > { %581 = vmatpush1.msra.mxu0 %v2128_v36  ;;  %650 = vmatpush1.msra.mxu1 %v2160_v43 }
  0xab   : > { %582 = vmatprep.subr.mxu0 %v2136_v38  ;;  %651 = vmatprep.subr.mxu1 %v2168_v45 }
  0xac   : > { %583 = vmatpush1.msra.mxu0 %v2145_v40  ;;  %652 = vmatpush1.msra.mxu1 %v2176_v47 }
  0xad   : > { %584 = vmatprep.subr.mxu0 %v2156_v42  ;;  %653 = vmatprep.subr.mxu1 %v2185_v49 }
  0xae   : > { %585 = vmatpush1.msra.mxu0 %v2164_v44  ;;  %654 = vmatpush1.msra.mxu1 %v2194_v51 }
  0xaf   : > { %586 = vmatprep.subr.mxu0 %v2172_v46  ;;  %655 = vmatprep.subr.mxu1 %v2202_v53 }
  0xb0   : > { %587 = vmatpush1.msra.mxu0 %v2181_v48  ;;  %656 = vmatpush1.msra.mxu1 %v2215_v57 }
  0xb1   : > { %588 = vmatprep.subr.mxu0 %v2190_v50  ;;  %657 = vmatprep.subr.mxu1 %v2699_v52  ;;  %v2704_v50 = vld [vmem:[#allocation31_spill] sm:$0xff] }
  0xb2   : > { %589 = vmatpush1.msra.mxu0 %v2700_v62  ;;  %658 = vmatpush1.msra.mxu1 %v2232_v61  ;;  %v2705_v62 = vmov 0.0  }
  0xb3   : > { %590 = vmatprep.subr.mxu0 %v2701_v0  ;;  %659 = vmatprep.subr.mxu1 %v2241_v63 }
  0xb4   : > { %591 = vmatpush1.msra.mxu0 %v2702_v56  ;;  %660 = vmatpush1.msra.mxu1 %v2248_v8 }
  0xb5   : > { %592 = vmatprep.subr.mxu0 %v2703_v54  ;;  %661 = vmatprep.subr.mxu1 %v2253_v55  ;;  %v360_v54 = vld [vmem:[%s359_s7] sm:$0xff]  ;;  %v361_v55 = vld [vmem:[%s359_s7 + $0x8] sm:$0xff] }
  0xb6   : > { %593 = vmatpush1.msra.mxu0 %v2704_v50  ;;  %662 = vmatpush1.msra.mxu1 %v2259_v58 }
  0xb7   : > { %626 = vmatprep.mubr.f32.mxu0 %v2705_v62  ;;  %663 = vmatprep.subr.mxu1 %v2265_v59  ;;  %v362_v59 = vld [vmem:[%s359_s7 + $0x10] sm:$0xff] }
  0xb8   : > { %697 = vmatprep.mubr.f32.mxu1 %v2705_v62  ;;  %664 = vmatpush1.msra.mxu1 %v2269_v60  ;;  %v363_v60 = vld [vmem:[%s359_s7 + $0x18] sm:$0xff]  ;;  %s753_s7 = scalar_lea.vmem %s1971_s27, %s1366_s23 [#allocation4] }
  0xb9   : > { %759 = vmatprep.subr.mxu0 %v1989_v1  ;;  %830 = vmatprep.subr.mxu1 %v2022_v11 }
 0x154   : > { %v431_v56 = vpop.f32.mrf.mxu0 }
 0x155   : > { %v507_v50 = vadd.f32 %v431_v56, %v360_v54 }
 0x156   : > { %v433_v0 = vpop.f32.mrf.mxu0 }
 0x157   : > { %v1326_v58 = vmul.f32 -1.442695, %v507_v50  ;;  %v508_v8 = vadd.f32 %v433_v0, %v361_v55  ;;  %v2707_v0 = vld [vmem:[#allocation19_spill] sm:$0xff] }
 0x158   : > { %v502_v62 = vpop.f32.mrf.mxu1 }
 0x159   : > { %1486 = vpow2.f32 %v1326_v58  ;;  %v1327_v63 = vmul.f32 -1.442695, %v508_v8  ;;  %v509_v61 = vadd.f32 %v502_v62, %v362_v59  ;;  %v530_v58 = vld [vmem:[#allocation3] sm:$0xff] }
 0x15a   : > { %v504_v48 = vpop.f32.mrf.mxu1 }
 0x15b   : > { %1488 = vpow2.f32 %v1327_v63  ;;  %v1328_v1 = vmul.f32 -1.442695, %v509_v61  ;;  %v510_v52 = vadd.f32 %v504_v48, %v363_v60  ;;  %v541_v63 = vpop.permute.xlu0 %540 }
 0x15c   : > { %vm542_vm2 = vcmp.eq.s32.totalorder %v541_v63, 1  ;;  %v2713_v63 = vld [vmem:[#allocation22_spill] sm:$0xff] }
 0x15d   : > { %1490 = vpow2.f32 %v1328_v1 }
 0x15e   : > { %1492 = vtanh.f32 %v510_v52 }
 0x166   : > { %v1487_v11 = vpop.eup %1486 }
 0x167   : > { %v520_v46 = vadd.f32 1.0, %v1487_v11 }
 0x168   : > { %v1489_v57 = vpop.eup %1488 }
 0x169   : > { %1494 = vrcp.f32 %v520_v46  ;;  %v521_v54 = vadd.f32 1.0, %v1489_v57 }
 0x16a   : > { %v1491_v50 = vpop.eup %1490 }
 0x16b   : > { %1496 = vrcp.f32 %v521_v54  ;;  %v1493_v56 = vpop.eup %1492  ;;  %v522_v55 = vadd.f32 1.0, %v1491_v50  ;;  %v2708_v54 = vld [vmem:[#allocation28_spill] sm:$0xff] }
 0x16c   : > { %v2709_v50 = vld [vmem:[#allocation20_spill] sm:$0xff] }
 0x16d   : > { %1498 = vrcp.f32 %v522_v55  ;;  %v2715_v55 = vld [vmem:[#allocation25_spill] sm:$0xff] }
 0x176   : > { %v1495_v8 = vpop.eup %1494 }
 0x177   : > { %v532_v61 = vmul.f32 %v1495_v8, %v1493_v56  ;;  %v2710_v56 = vld [vmem:[#allocation30_spill] sm:$0xff]  ;;  %v2711_v8 = vld [vmem:[#allocation21_spill] sm:$0xff] }
 0x178   : > { %v1497_v59 = vpop.eup %1496 }
 0x179   : > { %v531_v62 = vmul.f32 %v1497_v59, %v530_v58  ;;  %v2714_v59 = vld [vmem:[#allocation33_spill] sm:$0xff] }
 0x17a   : > { %v1499_v11 = vpop.eup %1498 }
 0x17b   : > { %v533_v48 = vadd.f32 %v532_v61, %v531_v62  ;;  %v2716_v62 = vld [vmem:[#allocation34_spill] sm:$0xff]  ;;  %v2717_v61 = vld [vmem:[#allocation27_spill] sm:$0xff] }
 0x17d   : > { %1500 = vtanh.f32 %v533_v48  ;;  %v2346_v1 = vsel %vm542_vm2, %v533_v48, %v530_v58  ;;  %v2712_v58 = vld [vmem:[#allocation32_spill] sm:$0xff]  ;;  %v2718_v48 = vld [vmem:[#allocation35_spill] sm:$0xff] }
 0x18a   : > { %v1501_v46 = vpop.eup %1500 }
 0x18b   : > { %v535_v57 = vmul.f32 %v1501_v46, %v1499_v11  ;;  %v2719_v11 = vld [vmem:[#allocation29_spill] sm:$0xff]  ;;  %v2720_v46 = vld [vmem:[#allocation36_spill] sm:$0xff] }
 0x18d   : > { %v2351_v60 = vsel %vm542_vm2, %v535_v57, %v2244_v5  ;;  %v548_v52 = vsel %vm542_vm2, %v535_v57, 0.0  ;;  %v2706_v5 = vld [vmem:[#allocation26_spill] sm:$0xff]  ;;  %v2721_v57 = vld [vmem:[#allocation31_spill] sm:$0xff] }
 0x18e   : > { %551 = vst [vmem:[%s550_s5] sm:$0xff] %v548_v52  ;;  %627 = vmatmul.mubr.f32.vlgmr.msra.gmra.mxu0 %v2351_v60  ;;  %698 = vmatmul.mubr.f32.vlgmr.msra.gmra.mxu1 %v2351_v60  ;;  %v2722_v52 = vmov 0.0   ;;  %s944_s5 = scalar_lea.vmem %s1985_s8, %s1345_s12 [#allocation9]  ;;  %s1740_s12 = smov [#allocation9]  }
 0x18f   : > { %760 = vmatpush1.msra.mxu0 %v1992_v2  ;;  %831 = vmatpush1.msra.mxu1 %v2030_v13 }
 0x190   : > { %761 = vmatprep.subr.mxu0 %v1995_v3  ;;  %832 = vmatprep.subr.mxu1 %v2039_v15 }
 0x191   : > { %762 = vmatpush1.msra.mxu0 %v1999_v4  ;;  %833 = vmatpush1.msra.mxu1 %v2042_v16 }
 0x192   : > { %763 = vmatprep.subr.mxu0 %v2004_v6  ;;  %834 = vmatprep.subr.mxu1 %v2050_v18 }
 0x193   : > { %764 = vmatpush1.msra.mxu0 %v2009_v7  ;;  %835 = vmatpush1.msra.mxu1 %v2058_v20 }
 0x194   : > { %765 = vmatprep.subr.mxu0 %v2014_v9  ;;  %836 = vmatprep.subr.mxu1 %v2061_v21 }
 0x195   : > { %766 = vmatpush1.msra.mxu0 %v2019_v10  ;;  %837 = vmatpush1.msra.mxu1 %v2071_v23 }
 0x196   : > { %767 = vmatprep.subr.mxu0 %v2026_v12  ;;  %838 = vmatprep.subr.mxu1 %v2079_v25 }
 0x197   : > { %768 = vmatpush1.msra.mxu0 %v2035_v14  ;;  %839 = vmatpush1.msra.mxu1 %v2087_v27 }
 0x198   : > { %769 = vmatprep.subr.mxu0 %v2046_v17  ;;  %840 = vmatprep.subr.mxu1 %v2097_v29 }
 0x199   : > { %770 = vmatpush1.msra.mxu0 %v2054_v19  ;;  %841 = vmatpush1.msra.mxu1 %v2105_v31 }
 0x19a   : > { %771 = vmatprep.subr.mxu0 %v2067_v22  ;;  %842 = vmatprep.subr.mxu1 %v2113_v33 }
 0x19b   : > { %772 = vmatpush1.msra.mxu0 %v2075_v24  ;;  %843 = vmatpush1.msra.mxu1 %v2121_v35 }
 0x19c   : > { %773 = vmatprep.subr.mxu0 %v2083_v26  ;;  %844 = vmatprep.subr.mxu1 %v2132_v37 }
 0x19d   : > { %774 = vmatpush1.msra.mxu0 %v2093_v28  ;;  %845 = vmatpush1.msra.mxu1 %v2140_v39 }
 0x19e   : > { %775 = vmatprep.subr.mxu0 %v2101_v30  ;;  %846 = vmatprep.subr.mxu1 %v2149_v41 }
 0x19f   : > { %776 = vmatpush1.msra.mxu0 %v2109_v32  ;;  %847 = vmatpush1.msra.mxu1 %v2160_v43 }
 0x1a0   : > { %777 = vmatprep.subr.mxu0 %v2117_v34  ;;  %848 = vmatprep.subr.mxu1 %v2168_v45 }
 0x1a1   : > { %778 = vmatpush1.msra.mxu0 %v2128_v36  ;;  %849 = vmatpush1.msra.mxu1 %v2176_v47 }
 0x1a2   : > { %779 = vmatprep.subr.mxu0 %v2136_v38  ;;  %850 = vmatprep.subr.mxu1 %v2185_v49 }
 0x1a3   : > { %780 = vmatpush1.msra.mxu0 %v2145_v40  ;;  %851 = vmatpush1.msra.mxu1 %v2194_v51 }
 0x1a4   : > { %781 = vmatprep.subr.mxu0 %v2156_v42  ;;  %852 = vmatprep.subr.mxu1 %v2202_v53 }
 0x1a5   : > { %782 = vmatpush1.msra.mxu0 %v2164_v44  ;;  %853 = vmatpush1.msra.mxu1 %v2706_v5 }
 0x1a6   : > { %783 = vmatprep.subr.mxu0 %v2707_v0  ;;  %854 = vmatprep.subr.mxu1 %v2708_v54  ;;  %v1334_v0 = vld [vmem:[%s1228_s20 + $0x38] sm:$0xff] }
 0x1a7   : > { %784 = vmatpush1.msra.mxu0 %v2709_v50  ;;  %855 = vmatpush1.msra.mxu1 %v2710_v56  ;;  %v1333_v50 = vld [vmem:[%s1228_s20 + $0x30] sm:$0xff] }
 0x1a8   : > { %785 = vmatprep.subr.mxu0 %v2711_v8  ;;  %856 = vmatprep.subr.mxu1 %v2712_v58 }
 0x1a9   : > { %786 = vmatpush1.msra.mxu0 %v2713_v63  ;;  %857 = vmatpush1.msra.mxu1 %v2714_v59  ;;  %v2723_v63 = vld [vmem:[#allocation37_spill] sm:$0xff] }
 0x1aa   : > { %787 = vmatprep.subr.mxu0 %v2715_v55  ;;  %858 = vmatprep.subr.mxu1 %v2716_v62  ;;  %v2724_v55 = vld [vmem:[#allocation16_spill] sm:$0xff]  ;;  %v2725_v62 = vld [vmem:[#allocation17_spill] sm:$0xff] }
 0x1ab   : > { %788 = vmatpush1.msra.mxu0 %v2717_v61  ;;  %859 = vmatpush1.msra.mxu1 %v2718_v48  ;;  %v1128_v48 = vstv %s948_s1  ;;  %v1332_v61 = vld [vmem:[%s1228_s20 + $0x28] sm:$0xff]  ;;  %s1354_s1 = smul.u32 4294967272, %s1718_s19 }
 0x1ac   : > { %789 = vmatprep.subr.mxu0 %v2719_v11  ;;  %860 = vmatprep.subr.mxu1 %v2720_v46  ;;  %v930_v46 = vstv %s750_s18  ;;  %v2727_v11 = vmov 0   ;;  %s1239_s18 = scalar_lea.vmem %s1971_s27, %s1346_s24 [#allocation4]  ;;  %s1367_s27 = sshll.u32 %s2124_s6, 3 }
 0x1ad   : > { %790 = vmatpush1.msra.mxu0 %v2721_v57  ;;  %823 = vmatprep.mubr.f32.mxu0 %v2722_v52  ;;  %v2726_v57 = vld [vmem:[#allocation24_spill] sm:$0xff]  ;;  %s1161_s3 = sadd.s32 %s1718_s19, %s1367_s27  ;;  %s1145_s19 = scalar_lea.sflag [#allocation6], %s1967_s26 }
 0x1ae   : > { %861 = vmatpush1.msra.mxu1 %v2723_v63  ;;  %894 = vmatprep.mubr.f32.mxu1 %v2722_v52  ;;  %vm931_vm3 = vcmp.gt.s32.totalorder %v2726_v57, %v930_v46  ;;  %vm1129_vm4 = vcmp.gt.s32.totalorder %v2726_v57, %v1128_v48  ;;  %s1360_s11 = sshll.u32 %s1161_s3, 7  ;;  %s1606_s6 = scalar_lea.vmem %s2529_s25, 512 }
 0x1af   : > { %957 = vmatprep.subr.mxu0 %v2724_v55  ;;  %1028 = vmatprep.subr.mxu1 %v2725_v62  ;;  %v932_v63 = vsel %vm931_vm3, 1, %v2727_v11  ;;  %v1130_v55 = vsel %vm1129_vm4, 1, %v2727_v11  ;;  %v1331_v62 = vld [vmem:[%s1228_s20 + $0x20] sm:$0xff]  ;;  %p1607_p1 = scmp.ne.s32.totalorder %s2529_s25, %s1606_s6 }
 0x1b0   : > { %934 = vperm.xlu1 %1485, %v932_v63  }
 0x1b1   : > { %p1608_p10 = pnand %p1607_p1, %p2749_p8 }
 0x1b3   : > { %p1609_p0 = pneg %p1608_p10 }
 0x1b4   : > { %1132 = vperm.xlu1 %1485, %v1130_v55  }
 0x24e   : > { %v628_v52 = vpop.f32.mrf.mxu0  ;;  %v699_v54 = vpop.f32.mrf.mxu1 }
 0x24f   : > { %v704_v59 = vadd.f32 %v1331_v62, %v628_v52  ;;  %v706_v63 = vadd.f32 %v1333_v50, %v699_v54  ;;  %v738_v54 = vpop.permute.xlu0 %737 }
 0x250   : > { %v630_v58 = vpop.f32.mrf.mxu0  ;;  %v701_v48 = vpop.f32.mrf.mxu1  ;;  %vm739_vm5 = vcmp.eq.s32.totalorder %v738_v54, 1  ;;  %v1347_v54 = vld [vmem:[%s1239_s18 + $0x60] sm:$0xff] }
 0x251   : > { %v1335_v8 = vmul.f32 -1.442695, %v704_v59  ;;  %v705_v56 = vadd.f32 %v1332_v61, %v630_v58  ;;  %v1337_v57 = vmul.f32 -1.442695, %v706_v63  ;;  %v707_v55 = vadd.f32 %v1334_v0, %v701_v48 }
 0x253   : > { %1502 = vpow2.f32 %v1335_v8  ;;  %v1336_v46 = vmul.f32 -1.442695, %v705_v56 }
 0x255   : > { %1504 = vpow2.f32 %v1336_v46 }
 0x256   : > { %1506 = vpow2.f32 %v1337_v57 }
 0x260   : > { %v1503_v11 = vpop.eup %1502 }
 0x261   : > { %v717_v5 = vadd.f32 1.0, %v1503_v11 }
 0x262   : > { %v1505_v44 = vpop.eup %1504 }
 0x263   : > { %1508 = vrcp.f32 %v717_v5  ;;  %v718_v53 = vadd.f32 1.0, %v1505_v44  ;;  %v1507_v58 = vpop.eup %1506 }
 0x264   : > { %1510 = vtanh.f32 %v707_v55  ;;  %v719_v61 = vadd.f32 1.0, %v1507_v58 }
 0x265   : > { %1512 = vrcp.f32 %v718_v53 }
 0x266   : > { %1514 = vrcp.f32 %v719_v61 }
 0x270   : > { %v1509_v8 = vpop.eup %1508 }
 0x271   : > { %v1511_v56 = vpop.eup %1510 }
 0x272   : > { %v1513_v59 = vpop.eup %1512  ;;  %v729_v52 = vmul.f32 %v1511_v56, %v1509_v8 }
 0x273   : > { %v728_v50 = vmul.f32 %v1513_v59, %v2346_v1  ;;  %v1515_v44 = vpop.eup %1514 }
 0x275   : > { %v730_v62 = vadd.f32 %v729_v52, %v728_v50  ;;  %v1348_v52 = vld [vmem:[%s1239_s18 + $0x68] sm:$0xff] }
 0x277   : > { %1516 = vtanh.f32 %v730_v62  ;;  %v2436_v5 = vsel %vm739_vm5, %v730_v62, %v2346_v1 }
 0x284   : > { %v1517_v53 = vpop.eup %1516 }
 0x285   : > { %v732_v0 = vmul.f32 %v1517_v53, %v1515_v44 }
 0x287   : > { %v2441_v46 = vsel %vm739_vm5, %v732_v0, %v2351_v60  ;;  %v745_v63 = vsel %vm739_vm5, %v732_v0, 0.0 }
 0x288   : > { %824 = vmatmul.mubr.f32.vlgmr.msra.gmra.mxu0 %v2441_v46  ;;  %895 = vmatmul.mubr.f32.vlgmr.msra.gmra.mxu1 %v2441_v46  ;;  %1339 = vst [vmem:[%s1231_s9 + $0x8] sm:$0xff] %v745_v63  ;;  %v1349_v63 = vld [vmem:[%s1239_s18 + $0x70] sm:$0xff]  ;;  %s2748_s9 = sld [smem:[#allocation39_spill]] }
 0x289   : > { %958 = vmatpush1.msra.mxu0 %v1992_v2  ;;  %1029 = vmatpush1.msra.mxu1 %v2030_v13  ;;  %v2728_v2 = vld [vmem:[#allocation23_spill] sm:$0xff]  ;;  %v2736_v13 = vld [vmem:[#allocation32_spill] sm:$0xff] }
 0x28a   : > { %959 = vmatprep.subr.mxu0 %v1995_v3  ;;  %1030 = vmatprep.subr.mxu1 %v2039_v15  ;;  %v2729_v3 = vld [vmem:[#allocation18_spill] sm:$0xff]  ;;  %v2738_v15 = vld [vmem:[#allocation33_spill] sm:$0xff] }
 0x28b   : > { %960 = vmatpush1.msra.mxu0 %v1999_v4  ;;  %1031 = vmatpush1.msra.mxu1 %v2042_v16  ;;  %v2730_v4 = vld [vmem:[#allocation26_spill] sm:$0xff]  ;;  %v2739_v16 = vld [vmem:[#allocation25_spill] sm:$0xff] }
 0x28c   : > { %961 = vmatprep.subr.mxu0 %v2004_v6  ;;  %1032 = vmatprep.subr.mxu1 %v2050_v18  ;;  %v2731_v6 = vld [vmem:[#allocation19_spill] sm:$0xff] }
 0x28d   : > { %962 = vmatpush1.msra.mxu0 %v2009_v7  ;;  %1033 = vmatpush1.msra.mxu1 %v2058_v20  ;;  %v2732_v7 = vld [vmem:[#allocation28_spill] sm:$0xff]  ;;  %v2741_v18 = vld [vmem:[#allocation27_spill] sm:$0xff]  ;;  %v2743_v20 = vld [vmem:[#allocation29_spill] sm:$0xff] }
 0x28e   : > { %963 = vmatprep.subr.mxu0 %v2014_v9  ;;  %1034 = vmatprep.subr.mxu1 %v2061_v21  ;;  %v2733_v9 = vld [vmem:[#allocation20_spill] sm:$0xff]  ;;  %s2526_s23 = scalar_lea.hbm %s2748_s9, %s1360_s11 }
 0x28f   : > { %964 = vmatpush1.msra.mxu0 %v2019_v10  ;;  %1035 = vmatpush1.msra.mxu1 %v2071_v23  ;;  %v2734_v10 = vld [vmem:[#allocation30_spill] sm:$0xff]  ;;  %v2744_v21 = vld [vmem:[#allocation36_spill] sm:$0xff]  ;;  %v2746_v23 = vmov 0.0  }
 0x290   : > { %965 = vmatprep.subr.mxu0 %v2026_v12  ;;  %1036 = vmatprep.subr.mxu1 %v2079_v25  ;;  %v2735_v12 = vld [vmem:[#allocation21_spill] sm:$0xff]  ;;  %v754_v25 = vld [vmem:[%s753_s7] sm:$0xff] }
 0x291   : > { %966 = vmatpush1.msra.mxu0 %v2035_v14  ;;  %1037 = vmatpush1.msra.mxu1 %v2087_v27  ;;  %v2737_v14 = vld [vmem:[#allocation22_spill] sm:$0xff]  ;;  %v755_v27 = vld [vmem:[%s753_s7 + $0x8] sm:$0xff] }
 0x292   : > { %967 = vmatprep.subr.mxu0 %v2046_v17  ;;  %1038 = vmatprep.subr.mxu1 %v2097_v29  ;;  %v2740_v17 = vld [vmem:[#allocation34_spill] sm:$0xff] }
 0x293   : > { %968 = vmatpush1.msra.mxu0 %v2054_v19  ;;  %1039 = vmatpush1.msra.mxu1 %v2105_v31  ;;  %v2742_v19 = vld [vmem:[#allocation35_spill] sm:$0xff] }
 0x294   : > { %969 = vmatprep.subr.mxu0 %v2067_v22  ;;  %1040 = vmatprep.subr.mxu1 %v2113_v33  ;;  %v2745_v22 = vld [vmem:[#allocation31_spill] sm:$0xff]  ;;  %v756_v33 = vld [vmem:[%s753_s7 + $0x10] sm:$0xff] }
 0x295   : > { %970 = vmatpush1.msra.mxu0 %v2075_v24  ;;  %1041 = vmatpush1.msra.mxu1 %v2121_v35  ;;  %v2747_v24 = vld [vmem:[#allocation37_spill] sm:$0xff] }
 0x296   : > { %971 = vmatprep.subr.mxu0 %v2083_v26  ;;  %1042 = vmatprep.subr.mxu1 %v2132_v37 }
 0x297   : > { %972 = vmatpush1.msra.mxu0 %v2093_v28  ;;  %1043 = vmatpush1.msra.mxu1 %v2140_v39 }
 0x298   : > { %973 = vmatprep.subr.mxu0 %v2101_v30  ;;  %1044 = vmatprep.subr.mxu1 %v2149_v41 }
 0x299   : > { %974 = vmatpush1.msra.mxu0 %v2109_v32  ;;  %1045 = vmatpush1.msra.mxu1 %v2160_v43 }
 0x29a   : > { %975 = vmatprep.subr.mxu0 %v2117_v34  ;;  %1046 = vmatprep.subr.mxu1 %v2168_v45 }
 0x29b   : > { %976 = vmatpush1.msra.mxu0 %v2128_v36  ;;  %1047 = vmatpush1.msra.mxu1 %v2176_v47  ;;  %v757_v36 = vld [vmem:[%s753_s7 + $0x18] sm:$0xff]  ;;  %s1243_s7 = scalar_lea.vmem %s1985_s8, %s1354_s1 [#allocation9] }
 0x29c   : > { %977 = vmatprep.subr.mxu0 %v2136_v38  ;;  %1048 = vmatprep.subr.mxu1 %v2185_v49 }
 0x29d   : > { %978 = vmatpush1.msra.mxu0 %v2145_v40  ;;  %1049 = vmatpush1.msra.mxu1 %v2194_v51  ;;  %v935_v51 = vpop.permute.xlu1 %934 }
 0x29e   : > { %979 = vmatprep.subr.mxu0 %v2156_v42  ;;  %1050 = vmatprep.subr.mxu1 %v2728_v2  ;;  %vm936_vm6 = vcmp.eq.s32.totalorder %v935_v51, 1 }
 0x29f   : > { %980 = vmatpush1.msra.mxu0 %v2729_v3  ;;  %1051 = vmatpush1.msra.mxu1 %v2730_v4 }
 0x2a0   : > { %981 = vmatprep.subr.mxu0 %v2731_v6  ;;  %1052 = vmatprep.subr.mxu1 %v2732_v7 }
 0x2a1   : > { %982 = vmatpush1.msra.mxu0 %v2733_v9  ;;  %1053 = vmatpush1.msra.mxu1 %v2734_v10 }
 0x2a2   : > { %983 = vmatprep.subr.mxu0 %v2735_v12  ;;  %1054 = vmatprep.subr.mxu1 %v2736_v13 }
 0x2a3   : > { %984 = vmatpush1.msra.mxu0 %v2737_v14  ;;  %1055 = vmatpush1.msra.mxu1 %v2738_v15 }
 0x2a4   : > { %985 = vmatprep.subr.mxu0 %v2739_v16  ;;  %1056 = vmatprep.subr.mxu1 %v2740_v17 }
 0x2a5   : > { %986 = vmatpush1.msra.mxu0 %v2741_v18  ;;  %1057 = vmatpush1.msra.mxu1 %v2742_v19  ;;  %v1133_v19 = vpop.permute.xlu1 %1132 }
 0x2a6   : > { %987 = vmatprep.subr.mxu0 %v2743_v20  ;;  %1058 = vmatprep.subr.mxu1 %v2744_v21  ;;  %vm1134_vm7 = vcmp.eq.s32.totalorder %v1133_v19, 1 }
 0x2a7   : > { %988 = vmatpush1.msra.mxu0 %v2745_v22  ;;  %1021 = vmatprep.mubr.f32.mxu0 %v2746_v23 }
 0x2a8   : > { %1059 = vmatpush1.msra.mxu1 %v2747_v24  ;;  %1092 = vmatprep.mubr.f32.mxu1 %v2746_v23 }
 0x348   : > { %v825_v26 = vpop.f32.mrf.mxu0  ;;  %v896_v34 = vpop.f32.mrf.mxu1 }
 0x349   : > { %v901_v28 = vadd.f32 %v825_v26, %v754_v25  ;;  %v903_v35 = vadd.f32 %v896_v34, %v756_v33 }
 0x34a   : > { %v827_v29 = vpop.f32.mrf.mxu0  ;;  %v898_v37 = vpop.f32.mrf.mxu1 }
 0x34b   : > { %v1342_v30 = vmul.f32 -1.442695, %v901_v28  ;;  %v902_v31 = vadd.f32 %v827_v29, %v755_v27  ;;  %v1344_v38 = vmul.f32 -1.442695, %v903_v35  ;;  %v904_v40 = vadd.f32 %v898_v37, %v757_v36 }
 0x34d   : > { %1518 = vpow2.f32 %v1342_v30  ;;  %v1343_v32 = vmul.f32 -1.442695, %v902_v31 }
 0x34f   : > { %1520 = vpow2.f32 %v1343_v32 }
 0x350   : > { %1522 = vpow2.f32 %v1344_v38 }
 0x35a   : > { %v1519_v39 = vpop.eup %1518 }
 0x35b   : > { %v914_v41 = vadd.f32 1.0, %v1519_v39 }
 0x35c   : > { %v1521_v42 = vpop.eup %1520 }
 0x35d   : > { %1524 = vrcp.f32 %v914_v41  ;;  %v915_v43 = vadd.f32 1.0, %v1521_v42  ;;  %v1523_v45 = vpop.eup %1522 }
 0x35e   : > { %1526 = vtanh.f32 %v904_v40  ;;  %v916_v60 = vadd.f32 1.0, %v1523_v45 }
 0x35f   : > { %1528 = vrcp.f32 %v915_v43 }
 0x360   : > { %1530 = vrcp.f32 %v916_v60 }
 0x36a   : > { %v1525_v47 = vpop.eup %1524 }
 0x36b   : > { %v1527_v49 = vpop.eup %1526 }
 0x36c   : > { %v1529_v1 = vpop.eup %1528  ;;  %v926_v57 = vmul.f32 %v1527_v49, %v1525_v47 }
 0x36d   : > { %v925_v48 = vmul.f32 %v1529_v1, %v2436_v5  ;;  %v1531_v58 = vpop.eup %1530 }
 0x36f   : > { %v927_v11 = vadd.f32 %v926_v57, %v925_v48 }
 0x371   : > { %1532 = vtanh.f32 %v927_v11  ;;  %v940_v55 = vsel %vm936_vm6, %v927_v11, %v2436_v5 }
 0x37e   : > { %v1533_v8 = vpop.eup %1532 }
 0x37f   : > { %v929_v56 = vmul.f32 %v1533_v8, %v1531_v58 }
 0x381   : > { %v937_v59 = vsel %vm936_vm6, %v929_v56, %v2441_v46  ;;  %v942_v61 = vsel %vm936_vm6, %v929_v56, 0.0  ;;  %v1350_v46 = vld [vmem:[%s1239_s18 + $0x78] sm:$0xff] }
 0x382   : > { %945 = vst [vmem:[%s944_s5] sm:$0xff] %v942_v61  ;;  %1022 = vmatmul.mubr.f32.vlgmr.msra.gmra.mxu0 %v937_v59  ;;  %1093 = vmatmul.mubr.f32.vlgmr.msra.gmra.mxu1 %v937_v59  ;;  %s1610_s5 = sshll.u32 %s1740_s12, 4  ;;  %s1611_s5 = int_to_ptr.vmem [resolvable:$false] %s1610_s5 }
 0x383   : > { %s1612_s8 = scalar_lea.vmem %s1611_s5, 1024  ;;  %p1613_p2 = scmp.lt.s32.totalorder %s2529_s25, %s1611_s5 }
 0x384   : > { %p1614_p3 = scmp.lt.s32.totalorder %s1612_s8, %s1606_s6 }
 0x386   : > { %p1615_p4 = por %p1614_p3, %p1613_p2 }
 0x388   : > { %p1616_p9 = pnand %p1615_p4, %p1609_p0 }
 0x442   : > { %v1023_v50 = vpop.f32.mrf.mxu0  ;;  %v1094_v2 = vpop.f32.mrf.mxu1 }
 0x443   : > { %v1099_v62 = vadd.f32 %v1347_v54, %v1023_v50  ;;  %v1101_v3 = vadd.f32 %v1349_v63, %v1094_v2 }
 0x444   : > { %v1025_v44 = vpop.f32.mrf.mxu0  ;;  %v1096_v4 = vpop.f32.mrf.mxu1 }
 0x445   : > { %v1351_v53 = vmul.f32 -1.442695, %v1099_v62  ;;  %v1100_v5 = vadd.f32 %v1348_v52, %v1025_v44  ;;  %v1353_v6 = vmul.f32 -1.442695, %v1101_v3  ;;  %v1102_v9 = vadd.f32 %v1350_v46, %v1096_v4 }
 0x447   : > { %1534 = vpow2.f32 %v1351_v53  ;;  %v1352_v0 = vmul.f32 -1.442695, %v1100_v5 }
 0x449   : > { %1536 = vpow2.f32 %v1352_v0 }
 0x44a   : > { %1538 = vpow2.f32 %v1353_v6 }
 0x454   : > { %v1535_v7 = vpop.eup %1534 }
 0x455   : > { %v1112_v10 = vadd.f32 1.0, %v1535_v7 }
 0x456   : > { %v1537_v12 = vpop.eup %1536 }
 0x457   : > { %1540 = vrcp.f32 %v1112_v10  ;;  %v1113_v13 = vadd.f32 1.0, %v1537_v12  ;;  %v1539_v14 = vpop.eup %1538 }
 0x458   : > { %1542 = vtanh.f32 %v1102_v9  ;;  %v1114_v18 = vadd.f32 1.0, %v1539_v14 }
 0x459   : > { %1544 = vrcp.f32 %v1113_v13 }
 0x45a   : > { %1546 = vrcp.f32 %v1114_v18 }
 0x464   : > { %v1541_v15 = vpop.eup %1540 }
 0x465   : > { %v1543_v16 = vpop.eup %1542 }
 0x466   : > { %v1545_v17 = vpop.eup %1544  ;;  %v1124_v21 = vmul.f32 %v1543_v16, %v1541_v15 }
 0x467   : > { %v1123_v20 = vmul.f32 %v1545_v17, %v940_v55  ;;  %v1547_v24 = vpop.eup %1546 }
 0x469   : > { %v1125_v22 = vadd.f32 %v1124_v21, %v1123_v20 }
 0x46b   : > { %1548 = vtanh.f32 %v1125_v22  ;;  %v1138_v23 = vsel %vm1134_vm7, %v1125_v22, %v940_v55 }
 0x46c   : > { %1139 = vst [vmem:[#allocation3] sm:$0xff] %v1138_v23 }
 0x478   : > { %v1549_v25 = vpop.eup %1548 }
 0x479   : > { %v1127_v26 = vmul.f32 %v1549_v25, %v1547_v24 }
 0x47b   : > { %v1135_v27 = vsel %vm1134_vm7, %v1127_v26, %v937_v59  ;;  %v1140_v28 = vsel %vm1134_vm7, %v1127_v26, 0.0 }
 0x47c   : > { %1136 = vst [vmem:[#allocation2] sm:$0xff] %v1135_v27  ;;  %1355 = vst [vmem:[%s1243_s7 + $0x18] sm:$0xff] %v1140_v28 }
 0x47d   : > { %1619 = shalt.err (!%p1616_p9)
}
 0x47e   : > { %s1620_s24 = scalar_lea.hbm %s2526_s23, 512  ;;  %s1624_s3 = scalar_lea.hbm %s2748_s9, 2048 }
 0x47f   : > { %p1621_p11 = scmp.ne.s32.totalorder %s2526_s23, %s1620_s24  ;;  %p1625_p5 = scmp.lt.s32.totalorder %s2526_s23, %s2748_s9 }
 0x480   : > { %p1626_p13 = scmp.lt.s32.totalorder %s1624_s3, %s1620_s24 }
 0x481   : > { %p1622_p12 = pnand %p1621_p11, %p2749_p8 }
 0x482   : > { %p1627_p6 = por %p1626_p13, %p1625_p5 }
 0x483   : > { %p1623_p7 = pneg %p1622_p12 }
 0x485   : > { %p1628_p1 = pnand %p1627_p6, %p1623_p7 }
 0x487   : > { %1631 = shalt.err (!%p1628_p1)
}
 0x488   : > { %s1741_s20 = smov 128   ;;  %s1742_s10 = smov 256  }
 0x489   : > { %s1743_s7 = smov 8  }
 0x48a   : > { %1372 = dma.vmem_to_hbm [thread:$0]  (%p2749_p8), %s2529_s25, 512, %s2526_s23, %s1145_s19, %s1741_s20, %s1742_s10, %s1743_s7  }
 0x48b PF: > { %p1386_p10 = scmp.ge.s32.totalorder %s1730_s22, 2  ;;  %s1179_s6 = sand.u32 1, %s1702_s15  }
 0x48c   : > { %p2750_p0 = scmp.ne.s32.totalorder %s2662_s30, 0  ;;  %s1180_s12 = scalar_lea.sflag [#allocation6], %s1179_s6 }
 0x48e   : > { %p1382_p2 = pnand %p1386_p10, %p2750_p0 }
 0x490   : > { %p1383_p3 = pneg %p1382_p2 }
 0x492   : > { %1685 = dma.done.wait (%p1383_p3), %s1180_s12, 512  }
 0x493   : > { %1687 = vsyncadd (%p1383_p3), %s1180_s12, 4294966784  ;;  %s22_s22 = sadd.s32 1, %s1730_s22   ;;  %s2751_s18 = sld [smem:[#allocation13_spill]] }
 0x494   : > { %p19_p4 = scmp.ge.s32.totalorder %s22_s22, 6   ;;  %s2752_s20 = sld [smem:[#allocation14_spill]] }
 0x495   : > { %s2753_s28 = sld [smem:[#allocation15_spill]]  ;;  %s2754_s12 = smov %s1694_s13 }
 0x496   : > { %s2755_s13 = smov %s1698_s14  ;;  %s2756_s14 = smov %s1938_s29 }
 0x497   : > { %s2757_s15 = smov %s1706_s16  ;;  %s2758_s16 = smov %s1710_s17 }
 0x498   : > { %s2759_s17 = smov %s1873_s4  ;;  %s2760_s19 = smov %s1726_s21 }
 0x499   :  { %21 = sbr.rel (!%p19_p4) target bundleno = 14 (0xe), region = 102 }
 0x49b   : > { %s2761_s21 = smov %s2753_s28 }
 0x49e   :  { %1185 = vsyncpa [#allocation5], 1 }
 0x49f   :  { %1187 = vsyncpa [#allocation5 + $0x1], 1 }
 0x4a0   :  { %1188 = vsyncpa [#allocation8], 1 }
 0x4a1   :  { %1190 = vsyncpa [#allocation8 + $0x1], 1 }
 0x4a2   :  { %1191 = vsyncpa [#allocation6], 1 }
 0x4a3   :  { %1193 = vsyncpa [#allocation6 + $0x1], 1 }

</bundles_post_ra>
